<compile_context>
chip_gen: v7x
topology: tpu7x:2x2x1
jax: 0.10.0
libtpu: 0.0.40
codegen_flags: <defaults>
</compile_context>

<pallas_src>
import functools

import jax
import jax.numpy as jnp
from jax.experimental import pallas as pl
from jax.experimental.pallas import tpu as pltpu

EPS = 1e-6
VMEM_LIMIT = 48 * 1024 * 1024  # safe on v5e/v6e (128 MiB) and v7x (64 MiB)


# ----------------------------- kernel helpers ------------------------------
def _rmsnorm(x, g):
    var = jnp.mean(x * x, axis=-1, keepdims=True)
    return x * jax.lax.rsqrt(var + EPS) * g


def _gelu(x):
    c = 0.7978845608028654  # sqrt(2/pi)
    return 0.5 * x * (1.0 + jnp.tanh(c * (x + 0.044715 * x * x * x)))


def _softmax(x):
    m = jnp.max(x, axis=-1, keepdims=True)
    e = jnp.exp(x - m)
    return e / jnp.sum(e, axis=-1, keepdims=True)


# ------------------------------ Pallas kernels -----------------------------
def blocks_kernel(pad_ref, x_ref, wqkv_ref, wo_ref, g1_ref, g2_ref,
                  w1_ref, w2_ref, o_ref, x_sc, *, num_heads):
    """All transformer blocks for one batch element.

    grid = (batch, layer); residual stream carried in VMEM scratch across the
    layer axis, written to HBM only after the last layer.
    """
    l = pl.program_id(1)

    @pl.when(l == 0)
    def _():
        x_sc[...] = x_ref[0].astype(jnp.float32)

    x = x_sc[...]                              # (S, D) f32 residual stream
    S, D = x.shape
    dh = D // num_heads
    scale = 1.0 / (dh ** 0.5)

    # ---- causal & pad mask built in-kernel (no O(S^2) HBM traffic) ----
    row = jax.lax.broadcasted_iota(jnp.int32, (S, S), 0)
    col = jax.lax.broadcasted_iota(jnp.int32, (S, S), 1)
    keep = (col <= row) & (pad_ref[0] > 0)     # (S,S) & (1,S) -> (S,S)

    # ---- attention sub-layer (pre-norm) ----
    h = _rmsnorm(x, g1_ref[0])
    qkv = jnp.dot(h.astype(jnp.bfloat16), wqkv_ref[0],
                  preferred_element_type=jnp.float32)          # (S, 3D) f32

    def split_heads(t):                        # (S, D) -> (H, S, dh)
        return jnp.stack(
            [t[:, i * dh:(i + 1) * dh] for i in range(num_heads)], axis=0)

    qh = split_heads(qkv[:, :D]).astype(jnp.bfloat16)
    kh = split_heads(qkv[:, D:2 * D]).astype(jnp.bfloat16)
    vh = split_heads(qkv[:, 2 * D:]).astype(jnp.bfloat16)

    s = jnp.einsum('hqd,hkd->hqk', qh, kh,
                   preferred_element_type=jnp.float32) * scale  # (H,S,S)
    s = jnp.where(keep[None, :, :], s, -1e30)
    m = jnp.max(s, axis=-1, keepdims=True)
    e = jnp.exp(s - m)
    denom = jnp.sum(e, axis=-1, keepdims=True)
    p = e * pl.reciprocal(denom, approx=True)                   # EUP divide

    ctx = jnp.einsum('hqk,hkd->hqd', p.astype(jnp.bfloat16), vh,
                     preferred_element_type=jnp.float32)        # (H,S,dh)
    ctx2d = jnp.concatenate([ctx[i] for i in range(num_heads)], axis=-1)

    attn = jnp.dot(ctx2d.astype(jnp.bfloat16), wo_ref[0],
                   preferred_element_type=jnp.float32)          # single K=D matmul
    x1 = x + attn

    # ---- MLP sub-layer (pre-norm, GELU) ----
    h2 = _rmsnorm(x1, g2_ref[0])
    ff = jnp.dot(h2.astype(jnp.bfloat16), w1_ref[0],
                 preferred_element_type=jnp.float32)
    ff = _gelu(ff)
    ff = jnp.dot(ff.astype(jnp.bfloat16), w2_ref[0],
                 preferred_element_type=jnp.float32)
    x_new = x1 + ff
    x_sc[...] = x_new

    @pl.when(l == pl.num_programs(1) - 1)
    def _():
        o_ref[0] = x_new.astype(o_ref.dtype)


def head_kernel(x_ref, g_ref, wv_ref, o_ref):
    """Final RMSNorm + vocab projection for one (batch, vocab-tile) cell."""
    x = _rmsnorm(x_ref[0].astype(jnp.float32), g_ref[...])
    o_ref[0] = jnp.dot(x.astype(jnp.bfloat16), wv_ref[...],
                       preferred_element_type=jnp.float32).astype(o_ref.dtype)


# ------------------------------ pallas_call glue ----------------------------
def run_blocks(x, pad3, p, num_heads):
    B, S, D = x.shape
    L = p["wqkv"].shape[0]
    F = p["w1"].shape[2]
    kernel = functools.partial(blocks_kernel, num_heads=num_heads)
    return pl.pallas_call(
        kernel,
        out_shape=jax.ShapeDtypeStruct((B, S, D), jnp.float32),
        grid=(B, L),
        in_specs=[
            pl.BlockSpec((1, 1, S), lambda b, l: (b, 0, 0)),        # pad vector
            pl.BlockSpec((1, S, D), lambda b, l: (b, 0, 0)),        # x (layer 0)
            pl.BlockSpec((1, D, 3 * D), lambda b, l: (l, 0, 0)),    # wqkv[l]
            pl.BlockSpec((1, D, D), lambda b, l: (l, 0, 0)),        # wo[l]
            pl.BlockSpec((1, 1, D), lambda b, l: (l, 0, 0)),        # norm1 gain
            pl.BlockSpec((1, 1, D), lambda b, l: (l, 0, 0)),        # norm2 gain
            pl.BlockSpec((1, D, F), lambda b, l: (l, 0, 0)),        # mlp w1[l]
            pl.BlockSpec((1, F, D), lambda b, l: (l, 0, 0)),        # mlp w2[l]
        ],
        out_specs=pl.BlockSpec((1, S, D), lambda b, l: (b, 0, 0)),
        scratch_shapes=[pltpu.VMEM((S, D), jnp.float32)],           # residual
        compiler_params=pltpu.CompilerParams(
            dimension_semantics=("parallel", "arbitrary"),
            vmem_limit_bytes=VMEM_LIMIT),
    )(pad3, x, p["wqkv"], p["wo"], p["g1"], p["g2"], p["w1"], p["w2"])


def run_head(x, g_out, w_vocab, *, tv=128):
    B, S, D = x.shape
    V = w_vocab.shape[1]
    assert V % tv == 0
    return pl.pallas_call(
        head_kernel,
        out_shape=jax.ShapeDtypeStruct((B, S, V), jnp.float32),
        grid=(B, V // tv),
        in_specs=[
            pl.BlockSpec((1, S, D), lambda b, j: (b, 0, 0)),
            pl.BlockSpec((1, D), lambda b, j: (0, 0)),
            pl.BlockSpec((D, tv), lambda b, j: (0, j)),
        ],
        out_specs=pl.BlockSpec((1, S, tv), lambda b, j: (b, 0, j)),
        compiler_params=pltpu.CompilerParams(
            dimension_semantics=("parallel", "parallel"),
            vmem_limit_bytes=VMEM_LIMIT),
    )(x, g_out, w_vocab)


def transformer_forward(ids, pad_mask, params, num_heads):
    B, S = ids.shape
    # glue: embedding gather + positional add (cheap, not hot path)
    x = (params["tok_emb"][ids] + params["pos_emb"][None, :S, :]).astype(jnp.float32)
    pad3 = pad_mask.reshape(B, 1, S).astype(jnp.int32)
    x = run_blocks(x, pad3, params, num_heads)
    return run_head(x, params["g_out"], params["w_vocab"])


# ------------------------------ pure-JAX reference ---------------------------
def reference_forward(ids, pad_mask, params, num_heads):
    B, S = ids.shape
    x = params["tok_emb"][ids] + params["pos_emb"][None, :S, :]
    D = x.shape[-1]
    H = num_heads
    dh = D // H
    scale = 1.0 / (dh ** 0.5)
    causal = jnp.tril(jnp.ones((S, S), dtype=bool))
    keep = causal[None, :, :] & (pad_mask[:, None, :] > 0)      # (B,S,S)

    def mm(a, w):  # mirror the kernel's bf16 MXU inputs / f32 accumulation
        return jnp.dot(a.astype(jnp.bfloat16), w, preferred_element_type=jnp.float32)

    L = params["wqkv"].shape[0]
    for l in range(L):
        h = _rmsnorm(x, params["g1"][l])
        qkv = mm(h, params["wqkv"][l])
        q, k, v = qkv[..., :D], qkv[..., D:2 * D], qkv[..., 2 * D:]
        q = q.reshape(B, S, H, dh).transpose(0, 2, 1, 3)
        k = k.reshape(B, S, H, dh).transpose(0, 2, 1, 3)
        v = v.reshape(B, S, H, dh).transpose(0, 2, 1, 3)
        s = jnp.einsum("bhqd,bhkd->bhqk", q.astype(jnp.bfloat16),
                       k.astype(jnp.bfloat16),
                       preferred_element_type=jnp.float32) * scale
        s = jnp.where(keep[:, None, :, :], s, -1e30)
        p = _softmax(s)
        ctx = jnp.einsum("bhqk,bhkd->bhqd", p.astype(jnp.bfloat16),
                         v.astype(jnp.bfloat16),
                         preferred_element_type=jnp.float32)
        ctx = ctx.transpose(0, 2, 1, 3).reshape(B, S, D)
        x = x + mm(ctx, params["wo"][l])
        h2 = _rmsnorm(x, params["g2"][l])
        x = x + mm(_gelu(mm(h2, params["w1"][l])), params["w2"][l])
    xo = _rmsnorm(x, params["g_out"])
    return mm(xo, params["w_vocab"])


# ---------------------------------- main -------------------------------------
if __name__ == "__main__":
    B, S, D, H, F, V, L = 2, 16, 128, 4, 256, 256, 2

    key = jax.random.PRNGKey(0)
    keys = jax.random.split(key, 8)

    def w(k, shape, scale=0.02):
        return (scale * jax.random.normal(k, shape)).astype(jnp.float32)

    params = dict(
        tok_emb=w(keys[0], (V, D)),
        pos_emb=w(keys[1], (S, D)),
        w_vocab=w(keys[2], (D, V)).astype(jnp.bfloat16),
        g_out=jnp.ones((1, D), jnp.float32),
        wqkv=w(keys[3], (L, D, 3 * D)).astype(jnp.bfloat16),
        wo=w(keys[4], (L, D, D)).astype(jnp.bfloat16),
        w1=w(keys[5], (L, D, F)).astype(jnp.bfloat16),
        w2=w(keys[6], (L, F, D)).astype(jnp.bfloat16),
        g1=jnp.ones((L, 1, D), jnp.float32),
        g2=jnp.ones((L, 1, D), jnp.float32),
    )

    ids = jax.random.randint(keys[7], (B, S), 0, V, dtype=jnp.int32)
    pad_mask = jnp.ones((B, S), jnp.int32).at[1, 12:].set(0)  # right pad batch 1

    logits = transformer_forward(ids, pad_mask, params, num_heads=H)
    jax.block_until_ready(logits)

    ref = reference_forward(ids, pad_mask, params, num_heads=H)
    assert logits.shape == (B, S, V)
    assert jnp.all(jnp.isfinite(logits))
    assert jnp.allclose(logits, ref, rtol=2e-2, atol=2e-2), (
        float(jnp.max(jnp.abs(logits - ref))))

    print("KERNEL_OK")
</pallas_src>

<mosaic_0001>
module attributes {stable_mosaic.version = 11 : i64} {
  func.func @blocks_kernel(%arg0: i32, %arg1: i32, %arg2: memref<1x1x16xi32, #tpu.memory_space<vmem>>, %arg3: memref<1x16x128xf32, #tpu.memory_space<vmem>>, %arg4: memref<1x128x384xbf16, #tpu.memory_space<vmem>>, %arg5: memref<1x128x128xbf16, #tpu.memory_space<vmem>>, %arg6: memref<1x1x128xf32, #tpu.memory_space<vmem>>, %arg7: memref<1x1x128xf32, #tpu.memory_space<vmem>>, %arg8: memref<1x128x256xbf16, #tpu.memory_space<vmem>>, %arg9: memref<1x256x128xbf16, #tpu.memory_space<vmem>>, %arg10: memref<1x16x128xf32, #tpu.memory_space<vmem>>, %arg11: memref<16x128xf32, #tpu.memory_space<vmem>>) attributes {dimension_semantics = [#tpu.dimension_semantics<parallel>, #tpu.dimension_semantics<arbitrary>], iteration_bounds = array<i64: 2, 2>, scalar_prefetch = 0 : i64, scratch_operands = 1 : i64, tpu.core_type = #tpu.core_type<tc>, window_params = [{transform_indices = @transform_0, window_bounds = array<i64: 1, 1, 16>}, {transform_indices = @transform_1, window_bounds = array<i64: 1, 16, 128>}, {transform_indices = @transform_2, window_bounds = array<i64: 1, 128, 384>}, {transform_indices = @transform_3, window_bounds = array<i64: 1, 128, 128>}, {transform_indices = @transform_4, window_bounds = array<i64: 1, 1, 128>}, {transform_indices = @transform_5, window_bounds = array<i64: 1, 1, 128>}, {transform_indices = @transform_6, window_bounds = array<i64: 1, 128, 256>}, {transform_indices = @transform_7, window_bounds = array<i64: 1, 256, 128>}, {transform_indices = @transform_8, window_bounds = array<i64: 1, 16, 128>}]} {
    %c0_i32 = arith.constant 0 : i32
    %0 = arith.cmpi eq, %arg1, %c0_i32 : i32
    %1 = arith.extui %0 : i1 to i32
    %c0_i32_0 = arith.constant 0 : i32
    %2 = arith.cmpi ne, %1, %c0_i32_0 : i32
    scf.if %2 {
      %c0_46 = arith.constant 0 : index
      %c0_47 = arith.constant 0 : index
      %c0_48 = arith.constant 0 : index
      %138 = vector.load %arg3[%c0_46, %c0_47, %c0_48] : memref<1x16x128xf32, #tpu.memory_space<vmem>>, vector<1x16x128xf32>
      %139 = vector.shape_cast %138 : vector<1x16x128xf32> to vector<16x128xf32>
      %c0_49 = arith.constant 0 : index
      %c0_50 = arith.constant 0 : index
      %140 = vector.load %arg11[%c0_49, %c0_50] : memref<16x128xf32, #tpu.memory_space<vmem>>, vector<16x128xf32>
      tpu.vector_store %arg11[%c0_49, %c0_50], %139 {strides = array<i32>} : memref<16x128xf32, #tpu.memory_space<vmem>>, vector<16x128xf32>,
    } else {
    }
    %c0 = arith.constant 0 : index
    %c0_1 = arith.constant 0 : index
    %3 = vector.load %arg11[%c0, %c0_1] : memref<16x128xf32, #tpu.memory_space<vmem>>, vector<16x128xf32>
    %4 = tpu.iota {dimensions = array<i32: 0>} : vector<16x16xi32>
    %5 = tpu.iota {dimensions = array<i32: 1>} : vector<16x16xi32>
    %6 = arith.cmpi sle, %5, %4 : vector<16x16xi32>
    %c0_2 = arith.constant 0 : index
    %c0_3 = arith.constant 0 : index
    %c0_4 = arith.constant 0 : index
    %7 = vector.load %arg2[%c0_2, %c0_3, %c0_4] : memref<1x1x16xi32, #tpu.memory_space<vmem>>, vector<1x1x16xi32>
    %8 = vector.shape_cast %7 : vector<1x1x16xi32> to vector<1x16xi32>
    %c0_i32_5 = arith.constant 0 : i32
    %9 = vector.broadcast %c0_i32_5 : i32 to vector<1x16xi32>
    %10 = arith.cmpi sgt, %8, %9 : vector<1x16xi32>
    %11 = vector.broadcast %10 : vector<1x16xi1> to vector<16x16xi1>
    %12 = arith.andi %6, %11 : vector<16x16xi1>
    %c0_6 = arith.constant 0 : index
    %c0_7 = arith.constant 0 : index
    %c0_8 = arith.constant 0 : index
    %13 = vector.load %arg6[%c0_6, %c0_7, %c0_8] : memref<1x1x128xf32, #tpu.memory_space<vmem>>, vector<1x1x128xf32>
    %14 = vector.shape_cast %13 : vector<1x1x128xf32> to vector<1x128xf32>
    %15 = arith.mulf %3, %3 : vector<16x128xf32>
    %cst = arith.constant dense<0.000000e+00> : vector<16xf32>
    %16 = vector.multi_reduction <add>, %15, %cst [1] : vector<16x128xf32> to vector<16xf32>
    %17 = vector.shape_cast %16 : vector<16xf32> to vector<16x1xf32>
    %cst_9 = arith.constant 1.280000e+02 : f32
    %18 = vector.broadcast %cst_9 : f32 to vector<16x1xf32>
    %19 = arith.divf %17, %18 : vector<16x1xf32>
    %cst_10 = arith.constant 9.99999997E-7 : f32
    %20 = vector.broadcast %cst_10 : f32 to vector<16x1xf32>
    %21 = arith.addf %19, %20 : vector<16x1xf32>
    %22 = math.rsqrt %21 : vector<16x1xf32>
    %23 = vector.broadcast %22 : vector<16x1xf32> to vector<16x128xf32>
    %24 = arith.mulf %3, %23 : vector<16x128xf32>
    %25 = vector.broadcast %14 : vector<1x128xf32> to vector<16x128xf32>
    %26 = arith.mulf %24, %25 : vector<16x128xf32>
    %27 = arith.truncf %26 : vector<16x128xf32> to vector<16x128xbf16>
    %c0_11 = arith.constant 0 : index
    %c0_12 = arith.constant 0 : index
    %c0_13 = arith.constant 0 : index
    %28 = vector.load %arg4[%c0_11, %c0_12, %c0_13] : memref<1x128x384xbf16, #tpu.memory_space<vmem>>, vector<1x128x384xbf16>
    %29 = vector.shape_cast %28 : vector<1x128x384xbf16> to vector<128x384xbf16>
    %cst_14 = arith.constant dense<0.000000e+00> : vector<16x384xf32>
    %30 = tpu.matmul %27, %29, %cst_14 {dimension_numbers = #tpu.dot_dimension_numbers<[1], [0], [0], [1], [0, 0, 1, 1], [], []>} : vector<16x128xbf16>, vector<128x384xbf16>, vector<16x384xf32> -> vector<16x384xf32>
    %31 = vector.extract_strided_slice %30 {offsets = [0, 0], sizes = [16, 128], strides = [1, 1]} : vector<16x384xf32> to vector<16x128xf32>
    %32 = vector.extract_strided_slice %31 {offsets = [0, 0], sizes = [16, 32], strides = [1, 1]} : vector<16x128xf32> to vector<16x32xf32>
    %33 = vector.extract_strided_slice %31 {offsets = [0, 32], sizes = [16, 32], strides = [1, 1]} : vector<16x128xf32> to vector<16x32xf32>
    %34 = vector.extract_strided_slice %31 {offsets = [0, 64], sizes = [16, 32], strides = [1, 1]} : vector<16x128xf32> to vector<16x32xf32>
    %35 = vector.extract_strided_slice %31 {offsets = [0, 96], sizes = [16, 32], strides = [1, 1]} : vector<16x128xf32> to vector<16x32xf32>
    %36 = vector.shape_cast %32 : vector<16x32xf32> to vector<1x16x32xf32>
    %37 = vector.shape_cast %33 : vector<16x32xf32> to vector<1x16x32xf32>
    %38 = vector.shape_cast %34 : vector<16x32xf32> to vector<1x16x32xf32>
    %39 = vector.shape_cast %35 : vector<16x32xf32> to vector<1x16x32xf32>
    %40 = tpu.concatenate %36, %37, %38, %39 in 0 : vector<1x16x32xf32>, vector<1x16x32xf32>, vector<1x16x32xf32>, vector<1x16x32xf32> -> vector<4x16x32xf32>
    %41 = arith.truncf %40 : vector<4x16x32xf32> to vector<4x16x32xbf16>
    %42 = vector.extract_strided_slice %30 {offsets = [0, 128], sizes = [16, 128], strides = [1, 1]} : vector<16x384xf32> to vector<16x128xf32>
    %43 = vector.extract_strided_slice %42 {offsets = [0, 0], sizes = [16, 32], strides = [1, 1]} : vector<16x128xf32> to vector<16x32xf32>
    %44 = vector.extract_strided_slice %42 {offsets = [0, 32], sizes = [16, 32], strides = [1, 1]} : vector<16x128xf32> to vector<16x32xf32>
    %45 = vector.extract_strided_slice %42 {offsets = [0, 64], sizes = [16, 32], strides = [1, 1]} : vector<16x128xf32> to vector<16x32xf32>
    %46 = vector.extract_strided_slice %42 {offsets = [0, 96], sizes = [16, 32], strides = [1, 1]} : vector<16x128xf32> to vector<16x32xf32>
    %47 = vector.shape_cast %43 : vector<16x32xf32> to vector<1x16x32xf32>
    %48 = vector.shape_cast %44 : vector<16x32xf32> to vector<1x16x32xf32>
    %49 = vector.shape_cast %45 : vector<16x32xf32> to vector<1x16x32xf32>
    %50 = vector.shape_cast %46 : vector<16x32xf32> to vector<1x16x32xf32>
    %51 = tpu.concatenate %47, %48, %49, %50 in 0 : vector<1x16x32xf32>, vector<1x16x32xf32>, vector<1x16x32xf32>, vector<1x16x32xf32> -> vector<4x16x32xf32>
    %52 = arith.truncf %51 : vector<4x16x32xf32> to vector<4x16x32xbf16>
    %53 = vector.extract_strided_slice %30 {offsets = [0, 256], sizes = [16, 128], strides = [1, 1]} : vector<16x384xf32> to vector<16x128xf32>
    %54 = vector.extract_strided_slice %53 {offsets = [0, 0], sizes = [16, 32], strides = [1, 1]} : vector<16x128xf32> to vector<16x32xf32>
    %55 = vector.extract_strided_slice %53 {offsets = [0, 32], sizes = [16, 32], strides = [1, 1]} : vector<16x128xf32> to vector<16x32xf32>
    %56 = vector.extract_strided_slice %53 {offsets = [0, 64], sizes = [16, 32], strides = [1, 1]} : vector<16x128xf32> to vector<16x32xf32>
    %57 = vector.extract_strided_slice %53 {offsets = [0, 96], sizes = [16, 32], strides = [1, 1]} : vector<16x128xf32> to vector<16x32xf32>
    %58 = vector.shape_cast %54 : vector<16x32xf32> to vector<1x16x32xf32>
    %59 = vector.shape_cast %55 : vector<16x32xf32> to vector<1x16x32xf32>
    %60 = vector.shape_cast %56 : vector<16x32xf32> to vector<1x16x32xf32>
    %61 = vector.shape_cast %57 : vector<16x32xf32> to vector<1x16x32xf32>
    %62 = tpu.concatenate %58, %59, %60, %61 in 0 : vector<1x16x32xf32>, vector<1x16x32xf32>, vector<1x16x32xf32>, vector<1x16x32xf32> -> vector<4x16x32xf32>
    %63 = arith.truncf %62 : vector<4x16x32xf32> to vector<4x16x32xbf16>
    "tpu.trace_start"() <{level = 10 : i32, message = "hqd,hkd->hqk"}> : () -> ()
    %cst_15 = arith.constant dense<0.000000e+00> : vector<4x16x16xf32>
    %64 = tpu.matmul %41, %52, %cst_15 {dimension_numbers = #tpu.dot_dimension_numbers<[2], [2], [1], [1], [0, 0, 0, 1, 1, 1], [0], [0]>} : vector<4x16x32xbf16>, vector<4x16x32xbf16>, vector<4x16x16xf32> -> vector<4x16x16xf32>
    "tpu.trace_stop"() : () -> ()
    %cst_16 = arith.constant 0.176776692 : f32
    %65 = vector.broadcast %cst_16 : f32 to vector<4x16x16xf32>
    %66 = arith.mulf %64, %65 : vector<4x16x16xf32>
    %67 = vector.shape_cast %12 : vector<16x16xi1> to vector<1x16x16xi1>
    %cst_17 = arith.constant -1.000000e+30 : f32
    %68 = vector.shape_cast %67 : vector<1x16x16xi1> to vector<1x16x16xi1>
    %69 = vector.broadcast %68 : vector<1x16x16xi1> to vector<4x16x16xi1>
    %70 = vector.broadcast %cst_17 : f32 to vector<4x16x16xf32>
    %71 = arith.select %69, %66, %70 : vector<4x16x16xi1>, vector<4x16x16xf32>
    %cst_18 = arith.constant dense<0xFF800000> : vector<4x16xf32>
    %72 = vector.multi_reduction <maximumf>, %71, %cst_18 [2] : vector<4x16x16xf32> to vector<4x16xf32>
    %73 = vector.shape_cast %72 : vector<4x16xf32> to vector<4x16x1xf32>
    %74 = vector.broadcast %73 : vector<4x16x1xf32> to vector<4x16x16xf32>
    %75 = arith.subf %71, %74 : vector<4x16x16xf32>
    %76 = math.exp %75 : vector<4x16x16xf32>
    %cst_19 = arith.constant dense<0.000000e+00> : vector<4x16xf32>
    %77 = vector.multi_reduction <add>, %76, %cst_19 [2] : vector<4x16x16xf32> to vector<4x16xf32>
    %78 = vector.shape_cast %77 : vector<4x16xf32> to vector<4x16x1xf32>
    %79 = tpu.reciprocal %78 {approx = true} : vector<4x16x1xf32> -> vector<4x16x1xf32>
    %80 = vector.broadcast %79 : vector<4x16x1xf32> to vector<4x16x16xf32>
    %81 = arith.mulf %76, %80 : vector<4x16x16xf32>
    %82 = arith.truncf %81 : vector<4x16x16xf32> to vector<4x16x16xbf16>
    "tpu.trace_start"() <{level = 10 : i32, message = "hqk,hkd->hqd"}> : () -> ()
    %cst_20 = arith.constant dense<0.000000e+00> : vector<4x16x32xf32>
    %83 = tpu.matmul %82, %63, %cst_20 {dimension_numbers = #tpu.dot_dimension_numbers<[2], [1], [1], [2], [0, 0, 0, 1, 1, 2], [0], [0]>} : vector<4x16x16xbf16>, vector<4x16x32xbf16>, vector<4x16x32xf32> -> vector<4x16x32xf32>
    "tpu.trace_stop"() : () -> ()
    %84 = vector.extract_strided_slice %83 {offsets = [0, 0, 0], sizes = [1, 16, 32], strides = [1, 1, 1]} : vector<4x16x32xf32> to vector<1x16x32xf32>
    %85 = vector.shape_cast %84 : vector<1x16x32xf32> to vector<16x32xf32>
    %86 = vector.extract_strided_slice %83 {offsets = [1, 0, 0], sizes = [1, 16, 32], strides = [1, 1, 1]} : vector<4x16x32xf32> to vector<1x16x32xf32>
    %87 = vector.shape_cast %86 : vector<1x16x32xf32> to vector<16x32xf32>
    %88 = vector.extract_strided_slice %83 {offsets = [2, 0, 0], sizes = [1, 16, 32], strides = [1, 1, 1]} : vector<4x16x32xf32> to vector<1x16x32xf32>
    %89 = vector.shape_cast %88 : vector<1x16x32xf32> to vector<16x32xf32>
    %90 = vector.extract_strided_slice %83 {offsets = [3, 0, 0], sizes = [1, 16, 32], strides = [1, 1, 1]} : vector<4x16x32xf32> to vector<1x16x32xf32>
    %91 = vector.shape_cast %90 : vector<1x16x32xf32> to vector<16x32xf32>
    %92 = tpu.concatenate %85, %87, %89, %91 in 1 : vector<16x32xf32>, vector<16x32xf32>, vector<16x32xf32>, vector<16x32xf32> -> vector<16x128xf32>
    %93 = arith.truncf %92 : vector<16x128xf32> to vector<16x128xbf16>
    %c0_21 = arith.constant 0 : index
    %c0_22 = arith.constant 0 : index
    %c0_23 = arith.constant 0 : index
    %94 = vector.load %arg5[%c0_21, %c0_22, %c0_23] : memref<1x128x128xbf16, #tpu.memory_space<vmem>>, vector<1x128x128xbf16>
    %95 = vector.shape_cast %94 : vector<1x128x128xbf16> to vector<128x128xbf16>
    %cst_24 = arith.constant dense<0.000000e+00> : vector<16x128xf32>
    %96 = tpu.matmul %93, %95, %cst_24 {dimension_numbers = #tpu.dot_dimension_numbers<[1], [0], [0], [1], [0, 0, 1, 1], [], []>} : vector<16x128xbf16>, vector<128x128xbf16>, vector<16x128xf32> -> vector<16x128xf32>
    %97 = arith.addf %3, %96 : vector<16x128xf32>
    %c0_25 = arith.constant 0 : index
    %c0_26 = arith.constant 0 : index
    %c0_27 = arith.constant 0 : index
    %98 = vector.load %arg7[%c0_25, %c0_26, %c0_27] : memref<1x1x128xf32, #tpu.memory_space<vmem>>, vector<1x1x128xf32>
    %99 = vector.shape_cast %98 : vector<1x1x128xf32> to vector<1x128xf32>
    %100 = arith.mulf %97, %97 : vector<16x128xf32>
    %cst_28 = arith.constant dense<0.000000e+00> : vector<16xf32>
    %101 = vector.multi_reduction <add>, %100, %cst_28 [1] : vector<16x128xf32> to vector<16xf32>
    %102 = vector.shape_cast %101 : vector<16xf32> to vector<16x1xf32>
    %cst_29 = arith.constant 1.280000e+02 : f32
    %103 = vector.broadcast %cst_29 : f32 to vector<16x1xf32>
    %104 = arith.divf %102, %103 : vector<16x1xf32>
    %cst_30 = arith.constant 9.99999997E-7 : f32
    %105 = vector.broadcast %cst_30 : f32 to vector<16x1xf32>
    %106 = arith.addf %104, %105 : vector<16x1xf32>
    %107 = math.rsqrt %106 : vector<16x1xf32>
    %108 = vector.broadcast %107 : vector<16x1xf32> to vector<16x128xf32>
    %109 = arith.mulf %97, %108 : vector<16x128xf32>
    %110 = vector.broadcast %99 : vector<1x128xf32> to vector<16x128xf32>
    %111 = arith.mulf %109, %110 : vector<16x128xf32>
    %112 = arith.truncf %111 : vector<16x128xf32> to vector<16x128xbf16>
    %c0_31 = arith.constant 0 : index
    %c0_32 = arith.constant 0 : index
    %c0_33 = arith.constant 0 : index
    %113 = vector.load %arg8[%c0_31, %c0_32, %c0_33] : memref<1x128x256xbf16, #tpu.memory_space<vmem>>, vector<1x128x256xbf16>
    %114 = vector.shape_cast %113 : vector<1x128x256xbf16> to vector<128x256xbf16>
    %cst_34 = arith.constant dense<0.000000e+00> : vector<16x256xf32>
    %115 = tpu.matmul %112, %114, %cst_34 {dimension_numbers = #tpu.dot_dimension_numbers<[1], [0], [0], [1], [0, 0, 1, 1], [], []>} : vector<16x128xbf16>, vector<128x256xbf16>, vector<16x256xf32> -> vector<16x256xf32>
    %cst_35 = arith.constant 5.000000e-01 : f32
    %116 = vector.broadcast %cst_35 : f32 to vector<16x256xf32>
    %117 = arith.mulf %116, %115 : vector<16x256xf32>
    %cst_36 = arith.constant 4.471500e-02 : f32
    %118 = vector.broadcast %cst_36 : f32 to vector<16x256xf32>
    %119 = arith.mulf %118, %115 : vector<16x256xf32>
    %120 = arith.mulf %119, %115 : vector<16x256xf32>
    %121 = arith.mulf %120, %115 : vector<16x256xf32>
    %122 = arith.addf %115, %121 : vector<16x256xf32>
    %cst_37 = arith.constant 0.797884583 : f32
    %123 = vector.broadcast %cst_37 : f32 to vector<16x256xf32>
    %124 = arith.mulf %123, %122 : vector<16x256xf32>
    %125 = math.tanh %124 : vector<16x256xf32>
    %cst_38 = arith.constant 1.000000e+00 : f32
    %126 = vector.broadcast %cst_38 : f32 to vector<16x256xf32>
    %127 = arith.addf %126, %125 : vector<16x256xf32>
    %128 = arith.mulf %117, %127 : vector<16x256xf32>
    %129 = arith.truncf %128 : vector<16x256xf32> to vector<16x256xbf16>
    %c0_39 = arith.constant 0 : index
    %c0_40 = arith.constant 0 : index
    %c0_41 = arith.constant 0 : index
    %130 = vector.load %arg9[%c0_39, %c0_40, %c0_41] : memref<1x256x128xbf16, #tpu.memory_space<vmem>>, vector<1x256x128xbf16>
    %131 = vector.shape_cast %130 : vector<1x256x128xbf16> to vector<256x128xbf16>
    %cst_42 = arith.constant dense<0.000000e+00> : vector<16x128xf32>
    %132 = tpu.matmul %129, %131, %cst_42 {dimension_numbers = #tpu.dot_dimension_numbers<[1], [0], [0], [1], [0, 0, 1, 1], [], []>} : vector<16x256xbf16>, vector<256x128xbf16>, vector<16x128xf32> -> vector<16x128xf32>
    %133 = arith.addf %97, %132 : vector<16x128xf32>
    %c0_43 = arith.constant 0 : index
    %c0_44 = arith.constant 0 : index
    %134 = vector.load %arg11[%c0_43, %c0_44] : memref<16x128xf32, #tpu.memory_space<vmem>>, vector<16x128xf32>
    tpu.vector_store %arg11[%c0_43, %c0_44], %133 {strides = array<i32>} : memref<16x128xf32, #tpu.memory_space<vmem>>, vector<16x128xf32>,
    %c1_i32 = arith.constant 1 : i32
    %135 = arith.cmpi eq, %arg1, %c1_i32 : i32
    %136 = arith.extui %135 : i1 to i32
    %c0_i32_45 = arith.constant 0 : i32
    %137 = arith.cmpi ne, %136, %c0_i32_45 : i32
    scf.if %137 {
      %c0_46 = arith.constant 0 : index
      %c0_47 = arith.constant 0 : index
      %c0_48 = arith.constant 0 : index
      %138 = vector.load %arg10[%c0_46, %c0_47, %c0_48] : memref<1x16x128xf32, #tpu.memory_space<vmem>>, vector<1x16x128xf32>
      %139 = vector.shape_cast %138 : vector<1x16x128xf32> to vector<16x128xf32>
      %140 = vector.shape_cast %133 : vector<16x128xf32> to vector<1x16x128xf32>
      tpu.vector_store %arg10[%c0_46, %c0_47, %c0_48], %140 {strides = array<i32>} : memref<1x16x128xf32, #tpu.memory_space<vmem>>, vector<1x16x128xf32>,
    } else {
    }
    return
  }
  func.func @transform_0(%arg0: i32, %arg1: i32) -> (i32, i32, i32) {
    %c0_i32 = arith.constant 0 : i32
    %c0_i32_0 = arith.constant 0 : i32
    %c0_i32_1 = arith.constant 0 : i32
    return %arg0, %c0_i32, %c0_i32_0 : i32, i32, i32
  }
  func.func @transform_1(%arg0: i32, %arg1: i32) -> (i32, i32, i32) {
    %c0_i32 = arith.constant 0 : i32
    %c0_i32_0 = arith.constant 0 : i32
    %c0_i32_1 = arith.constant 0 : i32
    return %arg0, %c0_i32, %c0_i32_0 : i32, i32, i32
  }
  func.func @transform_2(%arg0: i32, %arg1: i32) -> (i32, i32, i32) {
    %c0_i32 = arith.constant 0 : i32
    %c0_i32_0 = arith.constant 0 : i32
    %c0_i32_1 = arith.constant 0 : i32
    return %arg1, %c0_i32, %c0_i32_0 : i32, i32, i32
  }
  func.func @transform_3(%arg0: i32, %arg1: i32) -> (i32, i32, i32) {
    %c0_i32 = arith.constant 0 : i32
    %c0_i32_0 = arith.constant 0 : i32
    %c0_i32_1 = arith.constant 0 : i32
    return %arg1, %c0_i32, %c0_i32_0 : i32, i32, i32
  }
  func.func @transform_4(%arg0: i32, %arg1: i32) -> (i32, i32, i32) {
    %c0_i32 = arith.constant 0 : i32
    %c0_i32_0 = arith.constant 0 : i32
    %c0_i32_1 = arith.constant 0 : i32
    return %arg1, %c0_i32, %c0_i32_0 : i32, i32, i32
  }
  func.func @transform_5(%arg0: i32, %arg1: i32) -> (i32, i32, i32) {
    %c0_i32 = arith.constant 0 : i32
    %c0_i32_0 = arith.constant 0 : i32
    %c0_i32_1 = arith.constant 0 : i32
    return %arg1, %c0_i32, %c0_i32_0 : i32, i32, i32
  }
  func.func @transform_6(%arg0: i32, %arg1: i32) -> (i32, i32, i32) {
    %c0_i32 = arith.constant 0 : i32
    %c0_i32_0 = arith.constant 0 : i32
    %c0_i32_1 = arith.constant 0 : i32
    return %arg1, %c0_i32, %c0_i32_0 : i32, i32, i32
  }
  func.func @transform_7(%arg0: i32, %arg1: i32) -> (i32, i32, i32) {
    %c0_i32 = arith.constant 0 : i32
    %c0_i32_0 = arith.constant 0 : i32
    %c0_i32_1 = arith.constant 0 : i32
    return %arg1, %c0_i32, %c0_i32_0 : i32, i32, i32
  }
  func.func @transform_8(%arg0: i32, %arg1: i32) -> (i32, i32, i32) {
    %c0_i32 = arith.constant 0 : i32
    %c0_i32_0 = arith.constant 0 : i32
    %c0_i32_1 = arith.constant 0 : i32
    return %arg0, %c0_i32, %c0_i32_0 : i32, i32, i32
  }
}

</mosaic_0001>

<bundles_post_ra>
// kernel: tpu_custom_call.1
= control target key start
LH: loop header
LB: loop body
LE: loop exit
PB: predicated region body
PF: predicated region fallthrough
CT: control target
= control target key end

     0   :  { %s3834_s0 = inlined_call_operand.hbm [shape: s32[2,1,16], index: 0, kind: input, shape index: {}]   ;;  %s3835_s1 = inlined_call_operand.hbm [shape: f32[2,16,128], index: 1, kind: input, shape index: {}]   ;;  %s3836_s2 = inlined_call_operand.hbm [shape: bf16[2,128,384], index: 2, kind: input, shape index: {}]   ;;  %s3837_s3 = inlined_call_operand.hbm [shape: bf16[2,128,128], index: 3, kind: input, shape index: {}]   ;;  %s3838_s4 = inlined_call_operand.vmem [shape: f32[2,1,128], index: 4, kind: input, shape index: {}]   ;;  %s3839_s5 = inlined_call_operand.vmem [shape: f32[2,1,128], index: 5, kind: input, shape index: {}]   ;;  %s3840_s6 = inlined_call_operand.hbm [shape: bf16[2,128,256], index: 6, kind: input, shape index: {}]   ;;  %s3841_s7 = inlined_call_operand.hbm [shape: bf16[2,256,128], index: 7, kind: input, shape index: {}]   ;;  %s3842_s8 = inlined_call_operand.hbm [shape: f32[2,16,128], index: 8, kind: output, shape index: {}]  }
   0x1   :  { %3872 = sst [smem:[#allocation33_spill]] %s3835_s1 }
   0x2   :  { %3873 = sst [smem:[#allocation34_spill]] %s3837_s3 }
   0x3   :  { %3874 = sst [smem:[#allocation35_spill]] %s3838_s4 }
   0x4   :  { %3875 = sst [smem:[#allocation36_spill]] %s3839_s5 }
   0x5   :  { %3876 = sst [smem:[#allocation37_spill]] %s3842_s8 }
   0x6   :  { %13 = vsyncpa [#allocation4], 0 }
   0x7   :  { %15 = vsyncpa [#allocation4 + $0x1], 0 }
   0x8   :  { %16 = vsyncpa [#allocation7], 0 }
   0x9   :  { %18 = vsyncpa [#allocation7 + $0x1], 0 }
   0xa   :  { %19 = vsyncpa [#allocation10], 0 }
   0xb   :  { %21 = vsyncpa [#allocation10 + $0x1], 0 }
   0xc   :  { %22 = vsyncpa [#allocation13], 0 }
   0xd   :  { %24 = vsyncpa [#allocation13 + $0x1], 0 }
   0xe   :  { %25 = vsyncpa [#allocation5], 0 }
   0xf   :  { %27 = vsyncpa [#allocation5 + $0x1], 0  ;;  %s3115_s27 = smov 0   ;;  %s3117_s28 = smov 0  }
  0x10   :  { %s3119_s29 = smov 0   ;;  %s3121_s30 = smov 0  }
  0x11   :  { %s3123_s9 = smov 0   ;;  %s3125_s10 = smov 0  }
  0x12   :  { %s3127_s11 = smov 0   ;;  %s3129_s12 = smov 0  }
  0x13   :  { %s3131_s13 = smov 0   ;;  %s3133_s14 = smov 0  }
  0x14   :  { %s3135_s15 = smov 0  }
  0x15 LB: > { %3877 = sst [smem:[#allocation21_spill]] %s3011_s28  ;;  %s3171_s16 = sadd.s32 4294967295, %s3047_s15   ;;  %s3047_s15 = sphi %s3135_s15, %s33_s15   ;;  %s3043_s14 = sphi %s3133_s14, %s3950_s14   ;;  %s3039_s13 = sphi %s3131_s13, %s3949_s13   ;;  %s3035_s12 = sphi %s3129_s12, %s3948_s12   ;;  %s3031_s11 = sphi %s3127_s11, %s3947_s11   ;;  %s3027_s10 = sphi %s3125_s10, %s3940_s10   ;;  %s3023_s9 = sphi %s3123_s9, %s3946_s9   ;;  %s3019_s30 = sphi %s3121_s30, %s3945_s30   ;;  %s3015_s29 = sphi %s3119_s29, %s3944_s29   ;;  %s3011_s28 = sphi %s3117_s28, %s3943_s28   ;;  %s3007_s27 = sphi %s3115_s27, %s3938_s27  }
  0x16   : > { %3878 = sst [smem:[#allocation22_spill]] %s3019_s30  ;;  %s2142_s17 = sadd.s32 4294967294, %s3047_s15  }
  0x17   : > { %3879 = sst [smem:[#allocation23_spill]] %s3027_s10  ;;  %p59_p0 = scmp.ne.s32.totalorder %s3027_s10, %s3023_s9 }
  0x18   : > { %3880 = sst [smem:[#allocation24_spill]] %s3031_s11  ;;  %p3850_p1 = scmp.eq.s32.totalorder %s3047_s15, 0 }
  0x19   : > { %3881 = sst [smem:[#allocation25_spill]] %s3035_s12  ;;  %p65_p2 = scmp.ne.s32.totalorder %s3023_s9, %s3019_s30 }
  0x1a   : > { %3882 = sst [smem:[#allocation26_spill]] %s3171_s16  ;;  %p3849_p3 = scmp.eq.s32.totalorder %s3171_s16, 0 }
  0x1b   : > { %p61_p4 = por %p3850_p1, %p59_p0  ;;  %p271_p5 = scmp.eq.s32.totalorder %s3171_s16, 3 }
  0x1c   : > { %p3187_p6 = por %p3849_p3, %p65_p2  ;;  %p277_p7 = scmp.eq.s32.totalorder %s2142_s17, 3 }
  0x1d   : > { %p3191_p8 = por %p271_p5, %p59_p0  ;;  %p3848_p10 = scmp.lt.s32.totalorder %s3047_s15, 4 }
  0x1e   : > { %s3883_s20 = scalar_select %p3187_p6, 1, 0 }
  0x1f   : > { %s3884_s21 = scalar_select %p3191_p8, 1, 0 }
  0x20   : > { %p3195_p9 = por %p277_p7, %p65_p2  ;;  %s3201_s23 = sand.u32 1, %s3027_s10  }
  0x21   : > { %3885 = sst [smem:[#allocation27_spill]] %s3884_s21  ;;  %p3206_p11 = pnand %p3848_p10, %p61_p4 }
  0x22   : > { %s3886_s22 = scalar_select %p3195_p9, 1, 0 }
  0x23   : > { %s3888_s25 = scalar_select %p3206_p11, 1, 0 }
  0x24   : > { %3887 = sst [smem:[#allocation28_spill]] %s3886_s22  ;;  %s2146_s26 = sshll.u32 %s3201_s23, 4 }
  0x25   : > { %s2246_s17 = sshll.u32 %s3043_s14, 8  ;;  %s3889_s1 = sld [smem:[#allocation33_spill]] }
  0x26   : > { %s318_s22 = scalar_lea.vmem [#allocation6], %s2146_s26  ;;  %s3890_s8 = sand.u32 1, %s3047_s15  }
  0x27   : > { %s325_s24 = sshll.u32 %s318_s22, 4  ;;  %s3222_s21 = scalar_lea.sflag [#allocation7], %s3890_s8  ;;  %s3217_s24 = int_to_ptr.vmem [resolvable:$true] %s325_s24 }
  0x28   : > { %p3852_p0 = pneg %p3206_p11 }
  0x2b   : > { %s3215_s30 = scalar_lea.hbm %s3889_s1, %s2246_s17  ;;  %s2734_s17 = scalar_lea.hbm %s3889_s1, 512 }
  0x2c   : > { %s2729_s12 = scalar_lea.hbm %s3215_s30, 256  ;;  %p2735_p5 = scmp.lt.u32.totalorder %s3215_s30, %s3889_s1 }
  0x2d   : > { %p2730_p13 = scmp.ne.s32.totalorder %s3215_s30, %s2729_s12  ;;  %p2736_p7 = scmp.lt.u32.totalorder %s2734_s17, %s2729_s12 }
  0x2e   : > { %p2738_p3 = scmp.lt.u32.totalorder %s2729_s12, %s3215_s30 }
  0x2f   : > { %p2732_p2 = pnand %p3852_p0, %p2730_p13  ;;  %p2737_p10 = por %p2736_p7, %p2735_p5 }
  0x31   : > { %p2733_p4 = pneg %p2732_p2  ;;  %p2739_p1 = por %p2738_p3, %p2737_p10 }
  0x33   : > { %p2740_p12 = pnand %p2739_p1, %p2733_p4 }
  0x35   : > { %2743 = shalt.err (!%p2740_p12)
}
  0x36   : > { %s2744_s8 = scalar_lea.vmem %s3217_s24, 256  ;;  %s3049_s18 = smov [#allocation6]  }
  0x37   : > { %p2745_p13 = scmp.ne.s32.totalorder %s3217_s24, %s2744_s8  ;;  %s2749_s19 = sshll.u32 %s3049_s18, 4  ;;  %s2750_s19 = int_to_ptr.vmem [resolvable:$false] %s2749_s19 }
  0x38   : > { %s2751_s26 = scalar_lea.vmem %s2750_s19, 512  ;;  %p2752_p8 = scmp.lt.s32.totalorder %s3217_s24, %s2750_s19 }
  0x39   : > { %p2747_p2 = pnand %p2745_p13, %p3852_p0  ;;  %p2753_p5 = scmp.lt.s32.totalorder %s2751_s26, %s2744_s8 }
  0x3b   : > { %p2748_p9 = pneg %p2747_p2  ;;  %p2754_p7 = por %p2753_p5, %p2752_p8 }
  0x3d   : > { %p2755_p3 = pnand %p2754_p7, %p2748_p9 }
  0x3f   : > { %2758 = shalt.err (!%p2755_p3)
}
  0x40   : > { %s3853_s12 = smov 128   ;;  %s3854_s17 = smov 8  }
  0x41   : > { %2418 = dma.hbm_to_vmem [thread:$0]  (!%p3206_p11), %s3215_s30, 256, %s3217_s24, %s3222_s21, %s3853_s12, %s3853_s12, %s3854_s17  }
  0x42   : > { %p429_p1 = scmp.lt.s32.totalorder %s3047_s15, 5  ;;  %p3891_p8 = scmp.ge.s32.totalorder %s3047_s15, 1 }
  0x43   : > { %s42_s8 = sadd.s32 1, %s3039_s13  ;;  %s104_s18 = sadd.s32 1, %s3015_s29 }
  0x44   : > { %p3256_p9 = pnand %p3891_p8, %p429_p1  ;;  %p43_p10 = scmp.ge.s32.totalorder %s42_s8, 2 }
  0x45   : > { %p111_p12 = scmp.ne.s32.totalorder %s3015_s29, %s3011_s28  ;;  %p117_p4 = scmp.ne.s32.totalorder %s3011_s28, %s3007_s27 }
  0x46   : > { %s3892_s22 = scalar_select %p3256_p9, 1, 0 }
  0x47   : > { %s3267_s19 = sand.u32 1, %s3015_s29   ;;  %s3952_s8 = smov (%p43_p10, %s42_s8), 0 }
  0x48   : > { %3893 = sst [smem:[#allocation29_spill]] %s3952_s8  ;;  %s3894_s30 = sadd.s32 1, %s3043_s14 }
  0x49   : > { %s3954_s30 = smov (!%p43_p10, %s3894_s30), %s3043_s14  ;;  %s101_s24 = ssub.s32 %s3039_s13, %s3952_s8 }
  0x4a   : > { %p3895_p13 = scmp.eq.s32.totalorder %s3047_s15, 0  ;;  %p47_p5 = scmp.ge.s32.totalorder %s3954_s30, 2 }
  0x4b   : > { %p102_p7 = scmp.eq.s32.totalorder %s101_s24, 0  ;;  %p3896_p3 = scmp.eq.s32.totalorder %s3171_s16, 0 }
  0x4c   : > { %p113_p2 = por %p111_p12, %p3895_p13  ;;  %p3899_p8 = scmp.lt.s32.totalorder %s3047_s15, 4 }
  0x4d   : > { %p3280_p1 = por %p117_p4, %p3896_p3  ;;  %s3956_s30 = smov (%p47_p5, %s3954_s30), 0 }
  0x4e   : > { %p3286_p0 = pnand %p3899_p8, %p113_p2  ;;  %3901 = sst [smem:[#allocation31_spill]] %s3956_s30 }
  0x4f   : > { %s3897_s26 = scalar_select %p3280_p1, 1, 0 }
  0x50   : > { %s3900_s27 = scalar_select %p3286_p0, 1, 0 }
  0x51   : > { %3898 = sst [smem:[#allocation30_spill]] %s3897_s26  ;;  %s49_s17 = ssub.s32 %s3043_s14, %s3956_s30 }
  0x52   : > { %s3293_s12 = scalar_select %p102_p7, %s3015_s29, %s104_s18  }
  0x53   : > { %p50_p10 = scmp.eq.s32.totalorder %s49_s17, 0  ;;  %s2150_s1 = sshll.u32 %s3267_s19, 6 }
  0x54   : > { %s2247_s24 = sshll.u32 %s3039_s13, 10  ;;  %s3902_s8 = sadd.s32 1, %s3027_s10 }
  0x55   : > { %s3302_s5 = scalar_select %p50_p10, %s3027_s10, %s3902_s8  }
  0x56   : > { %s3904_s3 = sld [smem:[#allocation34_spill]]  ;;  %s360_s28 = scalar_lea.vmem [#allocation9], %s2150_s1 }
  0x57   : > { %3903 = sst [smem:[#allocation32_spill]] %s3302_s5  ;;  %s367_s16 = sshll.u32 %s360_s28, 4  ;;  %s3309_s16 = int_to_ptr.vmem [resolvable:$true] %s367_s16 }
  0x58   : > { %s3905_s18 = sand.u32 1, %s3047_s15   ;;  %p3319_p4 = pneg %p3286_p0 }
  0x59   : > { %s3313_s17 = scalar_lea.sflag [#allocation10], %s3905_s18 }
  0x5a   : > { %s3906_s8 = scalar_select %p3319_p4, 1, 0 }
  0x5c   : > { %s3307_s26 = scalar_lea.hbm %s3904_s3, %s2247_s24  ;;  %s2764_s1 = scalar_lea.hbm %s3904_s3, 2048 }
  0x5d   : > { %s2759_s30 = scalar_lea.hbm %s3307_s26, 1024  ;;  %p2765_p5 = scmp.lt.u32.totalorder %s3307_s26, %s3904_s3 }
  0x5e   : > { %p2760_p12 = scmp.ne.s32.totalorder %s3307_s26, %s2759_s30  ;;  %p2766_p7 = scmp.lt.u32.totalorder %s2764_s1, %s2759_s30 }
  0x5f   : > { %p2768_p8 = scmp.lt.u32.totalorder %s2759_s30, %s3307_s26 }
  0x60   : > { %p2762_p13 = pnand %p3319_p4, %p2760_p12  ;;  %p2767_p3 = por %p2766_p7, %p2765_p5 }
  0x62   : > { %p2763_p2 = pneg %p2762_p13  ;;  %p2769_p10 = por %p2768_p8, %p2767_p3 }
  0x64   : > { %p2770_p1 = pnand %p2769_p10, %p2763_p2 }
  0x66   : > { %2773 = shalt.err (!%p2770_p1)
}
  0x67   : > { %s2774_s18 = scalar_lea.vmem %s3309_s16, 1024  ;;  %s3052_s4 = smov [#allocation9]  }
  0x68   : > { %p2775_p12 = scmp.ne.s32.totalorder %s3309_s16, %s2774_s18  ;;  %s2779_s11 = sshll.u32 %s3052_s4, 4  ;;  %s2780_s11 = int_to_ptr.vmem [resolvable:$false] %s2779_s11 }
  0x69   : > { %s2781_s28 = scalar_lea.vmem %s2780_s11, 2048  ;;  %p2782_p9 = scmp.lt.s32.totalorder %s3309_s16, %s2780_s11 }
  0x6a   : > { %p2777_p13 = pnand %p2775_p12, %p3319_p4  ;;  %p2783_p11 = scmp.lt.s32.totalorder %s2781_s28, %s2774_s18 }
  0x6c   : > { %p2778_p6 = pneg %p2777_p13  ;;  %p2784_p5 = por %p2783_p11, %p2782_p9 }
  0x6e   : > { %p2785_p7 = pnand %p2784_p5, %p2778_p6 }
  0x70   : > { %2788 = shalt.err (!%p2785_p7)
}
  0x71   : > { %s3867_s30 = smov 64   ;;  %s3054_s1 = smov 4  }
  0x72   : > { %2424 = dma.hbm_to_vmem [thread:$0]  (!%p3286_p0), %s3307_s26, 1024, %s3309_s16, %s3313_s17, %s3867_s30, %s3867_s30, %s3054_s1  }
  0x73   : > { %s2145_s24 = sshll.u32 %s3043_s14, 4  ;;  %s300_s18 = scalar_lea.vmem [#allocation3], %s3201_s23 }
  0x74   : > { %s307_s4 = sshll.u32 %s300_s18, 4  ;;  %s3351_s3 = scalar_lea.hbm %s3834_s0, %s2145_s24  ;;  %s308_s4 = int_to_ptr.vmem [resolvable:$true] %s307_s4 }
  0x75   : > { %s298_s5 = scalar_lea.sflag [#allocation4], %s3201_s23  ;;  %s2789_s10 = scalar_lea.hbm %s3351_s3, 16 }
  0x76   : > { %p2790_p6 = scmp.ne.s32.totalorder %s3351_s3, %s2789_s10  ;;  %p3907_p11 = scmp.ne.s32.totalorder %s3888_s25, 0 }
  0x77   : > { %s2794_s18 = scalar_lea.hbm %s3834_s0, 32  ;;  %p2795_p3 = scmp.lt.u32.totalorder %s3351_s3, %s3834_s0 }
  0x78   : > { %p3908_p9 = pneg %p3907_p11  ;;  %p2796_p8 = scmp.lt.u32.totalorder %s2794_s18, %s2789_s10 }
  0x79   : > { %p2798_p12 = scmp.lt.u32.totalorder %s2789_s10, %s3351_s3 }
  0x7a   : > { %p2792_p1 = pnand %p2790_p6, %p3908_p9  ;;  %p2797_p10 = por %p2796_p8, %p2795_p3 }
  0x7c   : > { %p2793_p2 = pneg %p2792_p1  ;;  %p2799_p13 = por %p2798_p12, %p2797_p10 }
  0x7e   : > { %p2800_p5 = pnand %p2799_p13, %p2793_p2 }
  0x80   : > { %2803 = shalt.err (!%p2800_p5)
}
  0x81   : > { %s2804_s23 = scalar_lea.vmem %s308_s4, 16  ;;  %p3909_p6 = pmov %p3908_p9 }
  0x82   : > { %p2805_p7 = scmp.ne.s32.totalorder %s308_s4, %s2804_s23  ;;  %s3055_s24 = smov [#allocation3]  }
  0x83   : > { %s2809_s28 = sshll.u32 %s3055_s24, 4  ;;  %s2810_s28 = int_to_ptr.vmem [resolvable:$false] %s2809_s28 }
  0x84   : > { %p2807_p9 = pnand %p2805_p7, %p3909_p6  ;;  %s2811_s16 = scalar_lea.vmem %s2810_s28, 32 }
  0x85   : > { %p2812_p0 = scmp.lt.s32.totalorder %s308_s4, %s2810_s28  ;;  %p2813_p4 = scmp.lt.s32.totalorder %s2811_s16, %s2804_s23 }
  0x86   : > { %p2808_p1 = pneg %p2807_p9 }
  0x87   : > { %p2814_p3 = por %p2813_p4, %p2812_p0 }
  0x89   : > { %p2815_p8 = pnand %p2814_p3, %p2808_p1 }
  0x8b   : > { %2818 = shalt.err (!%p2815_p8)
}
  0x8c   : > { %2415 = dma.hbm_to_vmem [thread:$0]  (!%p3907_p11), %s3351_s3, 16, %s308_s4, %s298_s5  }
  0x8d   : > { %s2395_s10 = smul.u32 192, %s3267_s19  ;;  %s2153_s26 = sshll.u32 %s3267_s19, 7 }
  0x8e   : > { %s2396_s30 = smul.u32 3072, %s3039_s13  ;;  %p3910_p4 = scmp.ne.s32.totalorder %s3906_s8, 0 }
  0x8f   : > { %s339_s23 = scalar_lea.vmem [#allocation8], %s2395_s10  ;;  %s2824_s4 = scalar_lea.hbm %s3836_s2, 6144 }
  0x90   : > { %s3379_s24 = scalar_lea.hbm %s3836_s2, %s2396_s30  ;;  %s346_s25 = sshll.u32 %s339_s23, 4  ;;  %s3381_s25 = int_to_ptr.vmem [resolvable:$true] %s346_s25 }
  0x91   : > { %s2819_s28 = scalar_lea.hbm %s3379_s24, 3072  ;;  %p2825_p10 = scmp.lt.u32.totalorder %s3379_s24, %s3836_s2 }
  0x92   : > { %p2820_p0 = scmp.ne.s32.totalorder %s3379_s24, %s2819_s28  ;;  %p2826_p12 = scmp.lt.u32.totalorder %s2824_s4, %s2819_s28 }
  0x93   : > { %p2828_p5 = scmp.lt.u32.totalorder %s2819_s28, %s3379_s24 }
  0x94   : > { %p2822_p11 = pnand %p2820_p0, %p3910_p4  ;;  %p2827_p13 = por %p2826_p12, %p2825_p10 }
  0x96   : > { %p2823_p2 = pneg %p2822_p11  ;;  %p2829_p7 = por %p2828_p5, %p2827_p13 }
  0x98   : > { %p2830_p6 = pnand %p2829_p7, %p2823_p2 }
  0x9a   : > { %2833 = shalt.err (!%p2830_p6)
}
  0x9b   : > { %s2834_s10 = scalar_lea.vmem %s3381_s25, 3072  ;;  %s3056_s18 = smov [#allocation8]  }
  0x9c   : > { %p2835_p9 = scmp.ne.s32.totalorder %s3381_s25, %s2834_s10  ;;  %s2839_s11 = sshll.u32 %s3056_s18, 4  ;;  %s2840_s11 = int_to_ptr.vmem [resolvable:$false] %s2839_s11 }
  0x9d   : > { %s2841_s23 = scalar_lea.vmem %s2840_s11, 6144  ;;  %p2842_p8 = scmp.lt.s32.totalorder %s3381_s25, %s2840_s11 }
  0x9e   : > { %p2837_p1 = pnand %p2835_p9, %p3910_p4  ;;  %p2843_p0 = scmp.lt.s32.totalorder %s2841_s23, %s2834_s10 }
  0xa0   : > { %p2838_p3 = pneg %p2837_p1  ;;  %p2844_p11 = por %p2843_p0, %p2842_p8 }
  0xa2   : > { %p2845_p10 = pnand %p2844_p11, %p2838_p3 }
  0xa4   : > { %2848 = shalt.err (!%p2845_p10)
}
  0xa5   : > { %s3057_s28 = smov 192   ;;  %s3058_s3 = smov 12  }
  0xa6   : > { %p3911_p2 = scmp.ne.s32.totalorder %s3900_s27, 0  ;;  %s2248_s5 = sshll.u32 %s3039_s13, 11 }
  0xa7   : > { %s393_s4 = scalar_lea.vmem [#allocation11], %s2153_s26  ;;  %s3413_s18 = scalar_lea.hbm %s3840_s6, %s2248_s5 }
  0xa8   : > { %2421 = dma.hbm_to_vmem [thread:$0]  (!%p3911_p2), %s3379_s24, 3072, %s3381_s25, %s3222_s21, %s3057_s28, %s3057_s28, %s3058_s3  }
  0xa9   : > { %s400_s16 = sshll.u32 %s393_s4, 4  ;;  %s2849_s11 = scalar_lea.hbm %s3413_s18, 2048  ;;  %s3415_s16 = int_to_ptr.vmem [resolvable:$true] %s400_s16 }
  0xaa   : > { %p2850_p12 = scmp.ne.s32.totalorder %s3413_s18, %s2849_s11  ;;  %s2854_s25 = scalar_lea.hbm %s3840_s6, 4096 }
  0xab   : > { %p2855_p7 = scmp.lt.u32.totalorder %s3413_s18, %s3840_s6  ;;  %p2856_p6 = scmp.lt.u32.totalorder %s2854_s25, %s2849_s11 }
  0xac   : > { %p2852_p13 = pnand %p2850_p12, %p3910_p4  ;;  %p2858_p1 = scmp.lt.u32.totalorder %s2849_s11, %s3413_s18 }
  0xad   : > { %p2857_p9 = por %p2856_p6, %p2855_p7 }
  0xae   : > { %p2853_p5 = pneg %p2852_p13 }
  0xaf   : > { %p2859_p3 = por %p2858_p1, %p2857_p9 }
  0xb1   : > { %p2860_p8 = pnand %p2859_p3, %p2853_p5 }
  0xb3   : > { %2863 = shalt.err (!%p2860_p8)
}
  0xb4   : > { %s2864_s3 = scalar_lea.vmem %s3415_s16, 2048  ;;  %s3059_s4 = smov [#allocation11]  }
  0xb5   : > { %p2865_p0 = scmp.ne.s32.totalorder %s3415_s16, %s2864_s3  ;;  %s2869_s30 = sshll.u32 %s3059_s4, 4  ;;  %s2870_s30 = int_to_ptr.vmem [resolvable:$false] %s2869_s30 }
  0xb6   : > { %s2871_s10 = scalar_lea.vmem %s2870_s30, 4096  ;;  %p2872_p12 = scmp.lt.s32.totalorder %s3415_s16, %s2870_s30 }
  0xb7   : > { %p2867_p11 = pnand %p2865_p0, %p3910_p4  ;;  %p2873_p13 = scmp.lt.s32.totalorder %s2871_s10, %s2864_s3 }
  0xb9   : > { %p2868_p10 = pneg %p2867_p11  ;;  %p2874_p7 = por %p2873_p13, %p2872_p12 }
  0xbb   : > { %p2875_p6 = pnand %p2874_p7, %p2868_p10 }
  0xbd   : > { %2878 = shalt.err (!%p2875_p6)
}
  0xbe   : > { %s3912_s11 = smov 8   ;;  %s3913_s21 = smov 128  }
  0xbf   : > { %2427 = dma.hbm_to_vmem [thread:$0]  (!%p3911_p2), %s3413_s18, 2048, %s3415_s16, %s3313_s17, %s3913_s21, %s3913_s21, %s3912_s11  }
  0xc0   : > { %s3447_s23 = scalar_lea.hbm %s3841_s7, %s2248_s5  ;;  %s414_s28 = scalar_lea.vmem [#allocation12], %s2153_s26 }
  0xc1   : > { %s421_s3 = sshll.u32 %s414_s28, 4  ;;  %s411_s4 = scalar_lea.sflag [#allocation13], %s3267_s19  ;;  %s3451_s3 = int_to_ptr.vmem [resolvable:$true] %s421_s3 }
  0xc2   : > { %s2879_s30 = scalar_lea.hbm %s3447_s23, 2048  ;;  %s2884_s5 = scalar_lea.hbm %s3841_s7, 4096 }
  0xc3   : > { %p2880_p5 = scmp.ne.s32.totalorder %s3447_s23, %s2879_s30  ;;  %p2885_p3 = scmp.lt.u32.totalorder %s3447_s23, %s3841_s7 }
  0xc4   : > { %p2886_p8 = scmp.lt.u32.totalorder %s2884_s5, %s2879_s30  ;;  %p2888_p11 = scmp.lt.u32.totalorder %s2879_s30, %s3447_s23 }
  0xc5   : > { %p2882_p9 = pnand %p2880_p5, %p3910_p4 }
  0xc6   : > { %p2887_p0 = por %p2886_p8, %p2885_p3 }
  0xc7   : > { %p2883_p1 = pneg %p2882_p9 }
  0xc8   : > { %p2889_p10 = por %p2888_p11, %p2887_p0 }
  0xca   : > { %p2890_p12 = pnand %p2889_p10, %p2883_p1 }
  0xcc   : > { %2893 = shalt.err (!%p2890_p12)
}
  0xcd   : > { %s2894_s26 = scalar_lea.vmem %s3451_s3, 2048  ;;  %s3060_s11 = smov [#allocation12]  }
  0xce   : > { %p2895_p13 = scmp.ne.s32.totalorder %s3451_s3, %s2894_s26  ;;  %s2899_s21 = sshll.u32 %s3060_s11, 4  ;;  %s2900_s21 = int_to_ptr.vmem [resolvable:$false] %s2899_s21 }
  0xcf   : > { %s2901_s24 = scalar_lea.vmem %s2900_s21, 4096  ;;  %p2902_p5 = scmp.lt.s32.totalorder %s3451_s3, %s2900_s21 }
  0xd0   : > { %p2897_p7 = pnand %p2895_p13, %p3910_p4  ;;  %p2903_p9 = scmp.lt.s32.totalorder %s2901_s24, %s2894_s26 }
  0xd2   : > { %p2898_p6 = pneg %p2897_p7  ;;  %p2904_p3 = por %p2903_p9, %p2902_p5 }
  0xd4   : > { %p2905_p8 = pnand %p2904_p3, %p2898_p6 }
  0xd6   : > { %2908 = shalt.err (!%p2905_p8)
}
  0xd7   : > { %s3914_s25 = smov 64   ;;  %p3915_p4 = scmp.ne.s32.totalorder %s3892_s22, 0 }
  0xd8   : > { %2430 = dma.hbm_to_vmem [thread:$0]  (!%p3911_p2), %s3447_s23, 2048, %s3451_s3, %s411_s4, %s3914_s25, %s3914_s25, %s3054_s1  }
  0xd9   : > { %433 = sbr.rel (%p3915_p4) target bundleno = 2583 (0xa17), region = 52  ;;  %s3483_s8 = sand.u32 (!%p3915_p4), 1, %s3023_s9  }
  0xda   : > { %s436_s28 = scalar_lea.sflag (!%p3915_p4), [#allocation4], %s3483_s8  ;;  %s438_s30 = scalar_lea.vmem (!%p3915_p4), [#allocation3], %s3483_s8 }
  0xdb   : > { %p3916_p1 = scmp.ne.s32.totalorder (!%p3915_p4), %s3883_s20, 0 }
  0xe0   : > { %2982 = dma.done.wait (%p3916_p1), %s436_s28, 16  }
  0xe1   : > { %2984 = vsyncadd (%p3916_p1), %s436_s28, 4294967280  ;;  %s3917_s19 = sld [smem:[#allocation26_spill]]  ;;  %s2160_s1 = sshll.u32 %s3483_s8, 4 }
  0xe2   : > { %s447_s23 = scalar_lea.vmem [#allocation6], %s2160_s1 }
  0xe7   : > { %s443_s27 = sand.u32 1, %s3917_s19  }
  0xe8   : > { %s444_s22 = scalar_lea.sflag [#allocation7], %s443_s27 }
  0xe9   : > { %2986 = dma.done.wait (%p3916_p1), %s444_s22, 256  }
  0xea   : > { %2988 = vsyncadd (%p3916_p1), %s444_s22, 4294967040  ;;  %s3918_s3 = sld [smem:[#allocation21_spill]]  ;;  %s3919_s4 = sld [smem:[#allocation30_spill]] }
  0xf0   : > { %s454_s17 = sand.u32 1, %s3918_s3   ;;  %p3920_p2 = scmp.ne.s32.totalorder %s3919_s4, 0 }
  0xf1   : > { %s2397_s16 = smul.u32 192, %s454_s17 }
  0xf3   : > { %s3498_s5 = scalar_lea.vmem [#allocation8], %s2397_s16 }
  0xf4   : > { %2990 = dma.done.wait (%p3920_p2), %s444_s22, 3072  }
  0xf5   : > { %2992 = vsyncadd (%p3920_p2), %s444_s22, 4294964224  ;;  %s2161_s18 = sshll.u32 %s454_s17, 6  ;;  %s462_s10 = scalar_lea.sflag [#allocation10], %s443_s27 }
  0xf6   : > { %s3504_s26 = scalar_lea.vmem [#allocation9], %s2161_s18 }
  0xf7   : > { %2994 = dma.done.wait (%p3920_p2), %s462_s10, 3072  }
  0xf8   : > { %2996 = vsyncadd (%p3920_p2), %s462_s10, 4294964224  ;;  %s2162_s20 = sshll.u32 %s454_s17, 7  ;;  %s480_s21 = scalar_lea.sflag [#allocation13], %s454_s17 }
  0xf9   : > { %s3510_s11 = scalar_lea.vmem [#allocation11], %s2162_s20  ;;  %s3512_s24 = scalar_lea.vmem [#allocation12], %s2162_s20 }
  0xfa   : > { %2998 = dma.done.wait (%p3920_p2), %s480_s21, 2048  }
  0xfb   : > { %3000 = vsyncadd (%p3920_p2), %s480_s21, 4294965248  ;;  %s3921_s25 = sld [smem:[#allocation24_spill]]  ;;  %s3922_s22 = sld [smem:[#allocation35_spill]] }
  0xfc   : > { %s3923_s18 = sld [smem:[#allocation36_spill]]  ;;  %s3530_s20 = scalar_lea.vmem [#allocation14], %s2160_s1 }
 0x101   : > { %p546_p0 = scmp.lt.s32.totalorder %s3921_s25, 1  ;;  %p2165_p11 = scmp.ne.s32.totalorder %s3921_s25, 0 }
 0x102   : > { %v557_v0 = vld [vmem:[%s447_s23] sm:$0xff] (!%p2165_p11)  ;;  %v558_v1 = vld [vmem:[%s447_s23 + $0x8] sm:$0xff] (!%p2165_p11) }
 0x103   : > { %s3520_s28 = scalar_select %p546_p0, %s3921_s25, 1 }
 0x104   : > { %556 = sbr.rel (%p2165_p11) target bundleno = 267 (0x10b), region = 80  ;;  %559 = vst [vmem:[#allocation2] sm:$0xff] (!%p2165_p11), %v557_v0  ;;  %560 = vst [vmem:[#allocation2 + $0x8] sm:$0xff] (!%p2165_p11), %v558_v1 }
 0x105   : > { %s548_s3 = scalar_lea.vmem %s3922_s22, %s3520_s28  ;;  %s551_s10 = scalar_lea.vmem %s3923_s18, %s3520_s28 }
 0x10b PF: > { %v3533_v2 = vld [vmem:[#allocation2] sm:$0xff]  ;;  %v3535_v3 = vld [vmem:[#allocation2 + $0x8] sm:$0xff]  ;;  %v3061_v6 = vmov 0.0   ;;  %v3062_v28 = vmov 0   ;;  %vm3063_vm0 = vmmov 0   ;;  %vm921_vm1 = vcmask 261120  }
 0x10c   : > { %v581_v4 = vmul.f32 %v3533_v2, %v3533_v2  ;;  %v2599_v5 = vld [vmem:[%s3498_s5 + $0x4] ss:$12 sps:$4 sm:$0xff]   ;;  %2307 = vmatprep.subr.bf16.mxu1 %v3061_v6  ;;  %v2601_v7 = vld [vmem:[%s3498_s5] ss:$12 sps:$4 sm:$0xff]   ;;  %v2602_v8 = vld [vmem:[%s3498_s5 + $0x8] ss:$12 sps:$4 sm:$0xff]   ;;  %v582_v9 = vmul.f32 %v3535_v3, %v3535_v3  ;;  %797 = vmatprep.mubr.bf16.mxu0 %v3062_v28 }
 0x10d   : > { %765 = vmatprep.subr.bf16.mxu0 %v2599_v5  ;;  %v2603_v10 = vld [vmem:[%s3498_s5 + $0x1c] ss:$12 sps:$4 sm:$0xff]   ;;  %2308 = vmatpush3.bf16.msra.mxu1 %v2602_v8  ;;  %v2605_v11 = vld [vmem:[%s3498_s5 + $0x18] ss:$12 sps:$4 sm:$0xff]   ;;  %v2606_v12 = vld [vmem:[%s3498_s5 + $0x20] ss:$12 sps:$4 sm:$0xff]  }
 0x10e   : > { %583 = vadd.xlane.f32.xlu0 %v581_v4  ;;  %766 = vmatpush1.bf16.msra.mxu0 %v2601_v7  ;;  %v2607_v13 = vld [vmem:[%s3498_s5 + $0x34] ss:$12 sps:$4 sm:$0xff]   ;;  %v2609_v14 = vld [vmem:[%s3498_s5 + $0x30] ss:$12 sps:$4 sm:$0xff]   ;;  %v2610_v15 = vld [vmem:[%s3498_s5 + $0x38] ss:$12 sps:$4 sm:$0xff]  }
 0x10f   : > { %767 = vmatprep.subr.bf16.mxu0 %v2603_v10  ;;  %2309 = vmatprep.subr.bf16.mxu1 %v3061_v6  ;;  %v2611_v16 = vld [vmem:[%s3498_s5 + $0x4c] ss:$12 sps:$4 sm:$0xff]   ;;  %v2613_v17 = vld [vmem:[%s3498_s5 + $0x48] ss:$12 sps:$4 sm:$0xff]   ;;  %v2614_v18 = vld [vmem:[%s3498_s5 + $0x50] ss:$12 sps:$4 sm:$0xff]  }
 0x110   : > { %v2615_v19 = vld [vmem:[%s3498_s5 + $0x64] ss:$12 sps:$4 sm:$0xff]   ;;  %v2617_v20 = vld [vmem:[%s3498_s5 + $0x60] ss:$12 sps:$4 sm:$0xff]   ;;  %v2618_v21 = vld [vmem:[%s3498_s5 + $0x68] ss:$12 sps:$4 sm:$0xff]   ;;  %2323 = vmatprep.mubr.msk.bf16.mxu1 %vm3063_vm0, %v3061_v6 }
 0x111   : > { %2310 = vmatpush3.bf16.msra.mxu1 %v2606_v12  ;;  %v2619_v22 = vld [vmem:[%s3498_s5 + $0x7c] ss:$12 sps:$4 sm:$0xff]   ;;  %v2621_v23 = vld [vmem:[%s3498_s5 + $0x78] ss:$12 sps:$4 sm:$0xff]   ;;  %v2622_v24 = vld [vmem:[%s3498_s5 + $0x80] ss:$12 sps:$4 sm:$0xff]  }
 0x112   : > { %585 = vadd.xlane.f32.xlu0 %v582_v9  ;;  %768 = vmatpush1.bf16.msra.mxu0 %v2605_v11  ;;  %v2623_v25 = vld [vmem:[%s3498_s5 + $0x94] ss:$12 sps:$4 sm:$0xff]   ;;  %v2625_v26 = vld [vmem:[%s3498_s5 + $0x90] ss:$12 sps:$4 sm:$0xff]   ;;  %v2626_v27 = vld [vmem:[%s3498_s5 + $0x98] ss:$12 sps:$4 sm:$0xff]  }
 0x113   : > { %2311 = vmatprep.subr.bf16.mxu1 %v3061_v6  ;;  %769 = vmatprep.subr.bf16.mxu0 %v2607_v13  ;;  %v2627_v29 = vld [vmem:[%s3498_s5 + $0xac] ss:$12 sps:$4 sm:$0xff]   ;;  %v2629_v30 = vld [vmem:[%s3498_s5 + $0xa8] ss:$12 sps:$4 sm:$0xff]   ;;  %v2630_v31 = vld [vmem:[%s3498_s5 + $0xb0] ss:$12 sps:$4 sm:$0xff]  }
 0x114   : > { %v2166_v41 = vld [vmem:[%s548_s3] ss:$0 sm:$0xff]  ;;  %s3064_s5 = smov 64   ;;  %s3065_s21 = smov 96   ;;  %vm1130_vm7 = vcmask 130048   ;;  %vm1425_vm9 = vcmask 523264  }
 0x115   : > { %2312 = vmatpush3.bf16.msra.mxu1 %v2610_v15  ;;  %s3066_s25 = smov 32   ;;  %vm1428_vm10 = vcmask 785408  }
 0x116   : > { %770 = vmatpush1.bf16.msra.mxu0 %v2609_v14  ;;  %2313 = vmatprep.subr.bf16.mxu1 %v3061_v6 }
 0x117   : > { %771 = vmatprep.subr.bf16.mxu0 %v2611_v16 }
 0x119   : > { %2314 = vmatpush3.bf16.msra.mxu1 %v2614_v18 }
 0x11a   : > { %772 = vmatpush1.bf16.msra.mxu0 %v2613_v17  ;;  %2315 = vmatprep.subr.bf16.mxu1 %v3061_v6 }
 0x11b   : > { %773 = vmatprep.subr.bf16.mxu0 %v2615_v19 }
 0x11d   : > { %2316 = vmatpush3.bf16.msra.mxu1 %v2618_v21 }
 0x11e   : > { %774 = vmatpush1.bf16.msra.mxu0 %v2617_v20  ;;  %2317 = vmatprep.subr.bf16.mxu1 %v3061_v6 }
 0x11f   : > { %775 = vmatprep.subr.bf16.mxu0 %v2619_v22 }
 0x121   : > { %2318 = vmatpush3.bf16.msra.mxu1 %v2622_v24 }
 0x122   : > { %776 = vmatpush1.bf16.msra.mxu0 %v2621_v23  ;;  %2319 = vmatprep.subr.bf16.mxu1 %v3061_v6 }
 0x123   : > { %777 = vmatprep.subr.bf16.mxu0 %v2623_v25  ;;  %v563_v25 = vlaneseq }
 0x125   : > { %2320 = vmatpush3.bf16.msra.mxu1 %v2626_v27  ;;  %v564_v27 = vshrl.u32 %v563_v25, 7 }
 0x126   : > { %778 = vmatpush1.bf16.msra.mxu0 %v2625_v26  ;;  %2321 = vmatprep.subr.bf16.mxu1 %v3061_v6  ;;  %v570_v26 = vld [vmem:[%s438_s30] sm:$0x1] }
 0x127   : > { %779 = vmatprep.subr.bf16.mxu0 %v2627_v29  ;;  %vm571_vm2 = vcmp.gt.s32.totalorder %v570_v26, 0  ;;  %v575_v29 = vsub.s32 0, %v564_v27 }
 0x129   : > { %2322 = vmatpush3.bf16.msra.mxu1 %v2630_v31 }
 0x12a   : > { %780 = vmatpush1.bf16.msra.mxu0 %v2629_v30  ;;  %2327 = vmatprep.subr.bf16.mxu1 %v3061_v6  ;;  %v572_v30 = vsel %vm571_vm2, 1, %v3062_v28 }
 0x12b   : > { %2351 = vmatprep.subr.bf16.mxu0 %v3061_v6  ;;  %v576_v31 = vrot.slane %v572_v30, %v575_v29 }
 0x12d   : > { %vm577_vm3 = vcmp.eq.s32.totalorder %v576_v31, 1 }
 0x19b   : > { %v584_v32 = vpop.xlane.xlu0 %583 }
 0x19c   : > { %v588_v33 = vmul.f32 0.0078125, %v584_v32  ;;  %v567_v32 = vand.u32 127, %v563_v25 }
 0x19e   : > { %v590_v34 = vadd.f32 1e-06, %v588_v33  ;;  %v565_v33 = vadd.s32 8, %v564_v27  ;;  %vm568_vm4 = vcmp.le.s32.totalorder %v567_v32, %v564_v27 }
 0x19f   : > { %v586_v35 = vpop.xlane.xlu0 %585  ;;  %vm3621_vm6 = vmand %vm568_vm4, %vm577_vm3 }
 0x1a0   : > { %2679 = vrsqrt.f32 %v590_v34  ;;  %v589_v36 = vmul.f32 0.0078125, %v586_v35  ;;  %vm569_vm5 = vcmp.le.s32.totalorder %v567_v32, %v565_v33 }
 0x1a1   : > { %vm3625_vm8 = vmand %vm569_vm5, %vm577_vm3 }
 0x1a2   : > { %v591_v37 = vadd.f32 1e-06, %v589_v36 }
 0x1a4   : > { %2681 = vrsqrt.f32 %v591_v37 }
 0x1aa   : > { %v2680_v38 = vpop.eup %2679 }
 0x1ab   : > { %v594_v39 = vmul.f32 %v2680_v38, %v3533_v2 }
 0x1ad   : > { %v602_v43 = vmul.f32 %v2166_v41, %v594_v39 }
 0x1ae   : > { %v2682_v40 = vpop.eup %2681 }
 0x1af   : > { %v595_v42 = vmul.f32 %v2682_v40, %v3535_v3 }
 0x1b1   : > { %v603_v44 = vmul.f32 %v2166_v41, %v595_v42 }
 0x1b3   : > { %v604_v45 = vpack.c.bf16 %v603_v44, %v602_v43 }
 0x1b5   : > { %798 = vmatmul.mubr.bf16.vlgmr.msra.gmra.mrb[0].mxu0 %v604_v45  ;;  %2324 = vmatmul.mubr.bf16.vlgmr.msra.gmra.mrb[0].mxu1 %v604_v45 }
 0x1b6   : > { %2329 = vmatprep.mubr.msk.bf16.mxu1 %vm3063_vm0, %v3061_v6  ;;  %2353 = vmatprep.mubr.msk.bf16.mxu0 %vm3063_vm0, %v3061_v6 }
 0x288   : > { %v799_v46 = vpop.f32.mrb[0].mxu0  ;;  %v842_v47 = vpop.f32.mrb[0].mxu1 }
 0x289   : > { %v801_v48 = vpop.f32.mrb[1].mxu0  ;;  %v2325_v49 = vpop.f32.mrb[1].mxu1 }
 0x28a   : > { %v803_v50 = vpop.f32.mrb[2].mxu0  ;;  %v845_v51 = vpop.f32.mrb[2].mxu1 }
 0x28b   : > { %v869_v52 = vpack.c.bf16 %v803_v50, %v799_v46  ;;  %v917_v53 = vpack.c.bf16 %v845_v51, %v842_v47  ;;  %v805_v54 = vpop.f32.mrb[3].mxu0  ;;  %v2326_v55 = vpop.f32.mrb[3].mxu1  ;;  %v2544_v56 = vpack.i.bf16 %v803_v50, %v799_v46  ;;  %v3589_v59 = vpack.i.bf16 %v845_v51, %v842_v47 }
 0x28c   : > { %v2549_v57 = vpack.i.bf16 %v805_v54, %v801_v48  ;;  %v893_v58 = vpack.c.bf16 %v805_v54, %v801_v48 }
 0x28d   : > { %2352 = vmatpush3.bf16.msra.mxu0 %v917_v53 }
 0x28e   : > { %2550 = vrot.lane.b32.xlu0 %v2549_v57, %s3064_s5  ;;  %2540 = vrot.lane.b32.xlu1 %v2549_v57, %s3065_s21  ;;  %v926_v60 = vsel %vm921_vm1, %v893_v58, 0 }
 0x28f   : > { %2328 = vmatpush3.bf16.xpose.msra.mxu1 %v926_v60  ;;  %2363 = vmatprep.subr.bf16.mxu0 %v3061_v6 }
 0x290   : > { %2333 = vmatprep.subr.bf16.mxu1 %v3061_v6 }
 0x292   : > { %2545 = vrot.lane.b32.xlu1 %v2544_v56, %s3065_s21 }
 0x296   : > { %2555 = vrot.lane.b32.xlu1 %v2544_v56, %s3064_s5  ;;  %2330 = vmatmul.mubr.msk.bf16.vlgmr.msra.gmra.mrb[4].mxu1 %vm921_vm1, %v869_v52 }
 0x297   : > { %2335 = vmatprep.mubr.msk.bf16.mxu1 %vm3063_vm0, %v3061_v6 }
 0x29a   : > { %2560 = vrot.lane.b32.xlu1 %v2549_v57, %s3066_s25 }
 0x29e   : > { %2565 = vrot.lane.b32.xlu1 %v2544_v56, %s3066_s25 }
 0x300   : > { %v2541_v61 = vpop.permute.xlu1 %2540  ;;  %v2551_v0 = vpop.permute.xlu0 %2550 }
 0x301   : > { %v2543_v62 = vunpack.i.h.bf16 %v2541_v61  ;;  %v2542_v63 = vunpack.i.l.bf16 %v2541_v61  ;;  %v2553_v3 = vunpack.i.h.bf16 %v2551_v0  ;;  %v2552_v4 = vunpack.i.l.bf16 %v2551_v0 }
 0x303   : > { %v894_v1 = vpack.c.bf16 %v2543_v62, %v2542_v63  ;;  %v895_v10 = vpack.c.bf16 %v2553_v3, %v2552_v4 }
 0x304   : > { %v2546_v2 = vpop.permute.xlu1 %2545 }
 0x305   : > { %v973_v5 = vsel %vm921_vm1, %v894_v1, 0  ;;  %v2548_v7 = vunpack.i.h.bf16 %v2546_v2  ;;  %v2547_v8 = vunpack.i.l.bf16 %v2546_v2  ;;  %v1020_v15 = vsel %vm921_vm1, %v895_v10, 0 }
 0x306   : > { %2334 = vmatpush3.bf16.xpose.msra.mxu1 %v973_v5 }
 0x307   : > { %2339 = vmatprep.subr.bf16.mxu1 %v3061_v6  ;;  %v870_v11 = vpack.c.bf16 %v2548_v7, %v2547_v8 }
 0x308   : > { %v2556_v9 = vpop.permute.xlu1 %2555 }
 0x309   : > { %v2558_v16 = vunpack.i.h.bf16 %v2556_v9  ;;  %v2557_v17 = vunpack.i.l.bf16 %v2556_v9 }
 0x30b   : > { %v871_v19 = vpack.c.bf16 %v2558_v16, %v2557_v17 }
 0x30c   : > { %v2561_v12 = vpop.permute.xlu1 %2560 }
 0x30d   : > { %v2563_v13 = vunpack.i.h.bf16 %v2561_v12  ;;  %v2562_v14 = vunpack.i.l.bf16 %v2561_v12  ;;  %2336 = vmatmul.mubr.msk.bf16.vlgmr.msra.gmra.mrb[8].mxu1 %vm921_vm1, %v870_v11 }
 0x30e   : > { %2340 = vmatpush3.bf16.xpose.msra.mxu1 %v1020_v15  ;;  %2341 = vmatprep.mubr.msk.bf16.mxu1 %vm3063_vm0, %v3061_v6 }
 0x30f   : > { %2345 = vmatprep.subr.bf16.mxu1 %v3061_v6  ;;  %v896_v18 = vpack.c.bf16 %v2563_v13, %v2562_v14 }
 0x310   : > { %v2566_v20 = vpop.permute.xlu1 %2565 }
 0x311   : > { %v1067_v21 = vsel %vm921_vm1, %v896_v18, 0  ;;  %v2568_v22 = vunpack.i.h.bf16 %v2566_v20  ;;  %v2567_v23 = vunpack.i.l.bf16 %v2566_v20 }
 0x313   : > { %v872_v24 = vpack.c.bf16 %v2568_v22, %v2567_v23 }
 0x315   : > { %2342 = vmatmul.mubr.msk.bf16.vlgmr.msra.gmra.mrb[12].mxu1 %vm921_vm1, %v871_v19 }
 0x316   : > { %2346 = vmatpush3.bf16.xpose.msra.mxu1 %v1067_v21  ;;  %2347 = vmatprep.mubr.msk.bf16.mxu1 %vm3063_vm0, %v3061_v6 }
 0x317   : > { %2357 = vmatprep.subr.bf16.mxu1 %v3061_v6 }
 0x31d   : > { %2348 = vmatmul.mubr.msk.bf16.vlgmr.msra.gmra.mrb[16].mxu1 %vm921_vm1, %v872_v24 }
 0x31e   : > { %2359 = vmatprep.mubr.msk.bf16.mxu1 %vm3063_vm0, %v3061_v6 }
 0x369   : > { %v962_v34 = vpop.f32.mrb[4].mxu1 }
 0x36a   : > { %v1110_v36 = vmul.f32 0.17677669, %v962_v34  ;;  %v2331_v37 = vpop.f32.mrb[5].mxu1 }
 0x36b   : > { %v965_v38 = vpop.f32.mrb[6].mxu1 }
 0x36c   : > { %v1111_v40 = vmul.f32 0.17677669, %v965_v38  ;;  %v2332_v41 = vpop.f32.mrb[7].mxu1  ;;  %v1122_v42 = vsel %vm3621_vm6, %v1110_v36, -1e+30 }
 0x36d   : > { %v1131_v43 = vsel %vm1130_vm7, %v1122_v42, -inf }
 0x36e   : > { %1132 = vmax.xlane.f32.xlu1 %v1131_v43  ;;  %v1123_v44 = vsel %vm3625_vm8, %v1111_v40, -1e+30 }
 0x36f   : > { %v1134_v45 = vsel %vm1130_vm7, %v1123_v44, -inf }
 0x370   : > { %1135 = vmax.xlane.f32.xlu0 %v1134_v45 }
 0x3e0   : > { %v1009_v46 = vpop.f32.mrb[8].mxu1 }
 0x3e1   : > { %v1112_v47 = vmul.f32 0.17677669, %v1009_v46  ;;  %v2337_v48 = vpop.f32.mrb[9].mxu1 }
 0x3e2   : > { %v1012_v49 = vpop.f32.mrb[10].mxu1 }
 0x3e3   : > { %v1113_v50 = vmul.f32 0.17677669, %v1012_v49  ;;  %v2338_v51 = vpop.f32.mrb[11].mxu1  ;;  %v1124_v52 = vsel %vm3621_vm6, %v1112_v47, -1e+30 }
 0x3e4   : > { %v1137_v53 = vsel %vm1130_vm7, %v1124_v52, -inf }
 0x3e5   : > { %1138 = vmax.xlane.f32.xlu1 %v1137_v53  ;;  %v1125_v54 = vsel %vm3625_vm8, %v1113_v50, -1e+30 }
 0x3e6   : > { %v1140_v56 = vsel %vm1130_vm7, %v1125_v54, -inf }
 0x3e8   : > { %v1056_v55 = vpop.f32.mrb[12].mxu1 }
 0x3e9   : > { %v1114_v57 = vmul.f32 0.17677669, %v1056_v55  ;;  %1141 = vmax.xlane.f32.xlu1 %v1140_v56  ;;  %v2343_v58 = vpop.f32.mrb[13].mxu1 }
 0x3ea   : > { %v1059_v60 = vpop.f32.mrb[14].mxu1 }
 0x3eb   : > { %v1115_v61 = vmul.f32 0.17677669, %v1059_v60  ;;  %v2344_v62 = vpop.f32.mrb[15].mxu1  ;;  %v1126_v63 = vsel %vm3621_vm6, %v1114_v57, -1e+30 }
 0x3ec   : > { %v1143_v0 = vsel %vm1130_vm7, %v1126_v63, -inf }
 0x3ed   : > { %1144 = vmax.xlane.f32.xlu0 %v1143_v0  ;;  %v1127_v1 = vsel %vm3625_vm8, %v1115_v61, -1e+30 }
 0x3ee   : > { %v1146_v2 = vsel %vm1130_vm7, %v1127_v1, -inf }
 0x3ef   : > { %1147 = vmax.xlane.f32.xlu1 %v1146_v2 }
 0x3f0   : > { %v1103_v3 = vpop.f32.mrb[16].mxu1 }
 0x3f1   : > { %v1116_v4 = vmul.f32 0.17677669, %v1103_v3  ;;  %v2349_v5 = vpop.f32.mrb[17].mxu1 }
 0x3f2   : > { %v1106_v7 = vpop.f32.mrb[18].mxu1 }
 0x3f3   : > { %v1117_v8 = vmul.f32 0.17677669, %v1106_v7  ;;  %v2350_v9 = vpop.f32.mrb[19].mxu1  ;;  %v1128_v10 = vsel %vm3621_vm6, %v1116_v4, -1e+30 }
 0x3f4   : > { %v1149_v11 = vsel %vm1130_vm7, %v1128_v10, -inf }
 0x3f5   : > { %1150 = vmax.xlane.f32.xlu0 %v1149_v11  ;;  %v3652_v12 = vsel %vm3625_vm8, %v1117_v8, -1e+30 }
 0x3f6   : > { %v1152_v13 = vsel %vm1130_vm7, %v3652_v12, -inf }
 0x3f7   : > { %1153 = vmax.xlane.f32.xlu1 %v1152_v13 }
 0x3fb   : > { %v1133_v14 = vpop.xlane.xlu1 %1132 }
 0x3fc   : > { %v1155_v15 = vsub.f32 %v1122_v42, %v1133_v14 }
 0x3fd   : > { %v1136_v16 = vpop.xlane.xlu0 %1135 }
 0x3fe   : > { %v1163_v17 = vmul.f32 1.442695, %v1155_v15  ;;  %v1156_v18 = vsub.f32 %v1123_v44, %v1136_v16 }
 0x400   : > { %2683 = vpow2.f32 %v1163_v17  ;;  %v1165_v19 = vmul.f32 1.442695, %v1156_v18 }
 0x402   : > { %2685 = vpow2.f32 %v1165_v19 }
 0x40a   : > { %v2684_v20 = vpop.eup %2683 }
 0x40b   : > { %v1179_v21 = vsel %vm1130_vm7, %v2684_v20, 0.0 }
 0x40c   : > { %v2686_v22 = vpop.eup %2685  ;;  %1180 = vadd.xlane.f32.xlu0 %v1179_v21 }
 0x40d   : > { %v1182_v23 = vsel %vm1130_vm7, %v2686_v22, 0.0 }
 0x40e   : > { %1183 = vadd.xlane.f32.xlu1 %v1182_v23 }
 0x472   : > { %v1139_v24 = vpop.xlane.xlu1 %1138 }
 0x473   : > { %v1157_v25 = vsub.f32 %v1124_v52, %v1139_v24 }
 0x475   : > { %v1167_v26 = vmul.f32 1.442695, %v1157_v25 }
 0x476   : > { %v1142_v27 = vpop.xlane.xlu1 %1141 }
 0x477   : > { %2687 = vpow2.f32 %v1167_v26  ;;  %v1158_v29 = vsub.f32 %v1125_v54, %v1142_v27 }
 0x479   : > { %v1169_v30 = vmul.f32 1.442695, %v1158_v29 }
 0x47a   : > { %v1145_v31 = vpop.xlane.xlu0 %1144 }
 0x47b   : > { %2689 = vpow2.f32 %v1169_v30  ;;  %v1159_v32 = vsub.f32 %v1126_v63, %v1145_v31 }
 0x47c   : > { %v1148_v33 = vpop.xlane.xlu1 %1147 }
 0x47d   : > { %v1171_v34 = vmul.f32 1.442695, %v1159_v32  ;;  %v1160_v35 = vsub.f32 %v1127_v1, %v1148_v33 }
 0x47f   : > { %2691 = vpow2.f32 %v1171_v34  ;;  %v1173_v36 = vmul.f32 1.442695, %v1160_v35 }
 0x481   : > { %v3658_v37 = vpop.eup %2687  ;;  %2693 = vpow2.f32 %v1173_v36 }
 0x482   : > { %v1151_v38 = vpop.xlane.xlu0 %1150  ;;  %v1185_v39 = vsel %vm1130_vm7, %v3658_v37, 0.0 }
 0x483   : > { %v1161_v40 = vsub.f32 %v1128_v10, %v1151_v38  ;;  %1186 = vadd.xlane.f32.xlu0 %v1185_v39  ;;  %v2632_v38 = vld [vmem:[%s3504_s26 + $0x8] sm:$0xff]  }
 0x484   : > { %v1154_v50 = vpop.xlane.xlu1 %1153 }
 0x485   : > { %v2690_v41 = vpop.eup %2689  ;;  %v1175_v42 = vmul.f32 1.442695, %v1161_v40  ;;  %v1162_v58 = vsub.f32 %v3652_v12, %v1154_v50  ;;  %v2635_v50 = vld [vmem:[%s3504_s26 + $0x20] sm:$0xff]  }
 0x486   : > { %v1188_v43 = vsel %vm1130_vm7, %v2690_v41, 0.0 }
 0x487   : > { %2695 = vpow2.f32 %v1175_v42  ;;  %1189 = vadd.xlane.f32.xlu1 %v1188_v43  ;;  %v1177_v60 = vmul.f32 1.442695, %v1162_v58  ;;  %v2633_v43 = vld [vmem:[%s3504_s26 + $0x10] sm:$0xff]  }
 0x489   : > { %v2692_v44 = vpop.eup %2691 }
 0x48a   : > { %v1191_v45 = vsel %vm1130_vm7, %v2692_v44, 0.0 }
 0x48b   : > { %v2694_v46 = vpop.eup %2693  ;;  %1192 = vadd.xlane.f32.xlu0 %v1191_v45 }
 0x48c   : > { %v1194_v47 = vsel %vm1130_vm7, %v2694_v46, 0.0 }
 0x48d   : > { %1195 = vadd.xlane.f32.xlu1 %v1194_v47 }
 0x491   : > { %v3665_v48 = vpop.eup %2695 }
 0x492   : > { %v1197_v49 = vsel %vm1130_vm7, %v3665_v48, 0.0 }
 0x493   : > { %1198 = vadd.xlane.f32.xlu0 %v1197_v49  ;;  %v2634_v49 = vld [vmem:[%s3504_s26 + $0x18] sm:$0xff]  }
 0x499   : > { %v1181_v51 = vpop.xlane.xlu0 %1180 }
 0x49a   : > { %2697 = vrcp.f32 %v1181_v51  ;;  %v2636_v51 = vld [vmem:[%s3504_s26 + $0x28] sm:$0xff]  }
 0x49b   : > { %v1184_v52 = vpop.xlane.xlu1 %1183 }
 0x49c   : > { %2699 = vrcp.f32 %v1184_v52  ;;  %v2637_v52 = vld [vmem:[%s3504_s26 + $0x30] sm:$0xff]  }
 0x49d   : > { %2701 = vpow2.f32 %v1177_v60 }
 0x49e   : > { %2575 = vrot.lane.b32.xlu1 %v3589_v59, %s3064_s5 }
 0x4a4   : > { %v2698_v53 = vpop.eup %2697 }
 0x4a5   : > { %v1211_v55 = vmul.f32 %v2698_v53, %v2684_v20  ;;  %v2638_v53 = vld [vmem:[%s3504_s26 + $0x38] sm:$0xff]  }
 0x4a6   : > { %v2700_v54 = vpop.eup %2699 }
 0x4a7   : > { %v1212_v56 = vmul.f32 %v2700_v54, %v2686_v22  ;;  %v2702_v61 = vpop.eup %2701 }
 0x4a8   : > { %v1200_v62 = vsel %vm1130_vm7, %v2702_v61, 0.0 }
 0x4a9   : > { %2570 = vrot.lane.b32.xlu0 %v3589_v59, %s3065_s21  ;;  %v1219_v57 = vpack.c.bf16 %v1212_v56, %v1211_v55 }
 0x4ab   : > { %2354 = vmatmul.mubr.msk.bf16.vlgmr.msra.gmra.mrb[4].mxu0 %vm1130_vm7, %v1219_v57 }
 0x4ac   : > { %2365 = vmatprep.mubr.msk.bf16.mxu0 %vm3063_vm0, %v3061_v6 }
 0x4c2   : > { %1201 = vadd.xlane.f32.xlu1 %v1200_v62 }
 0x4d3   : > { %2580 = vrot.lane.b32.xlu1 %v3589_v59, %s3066_s25 }
 0x510   : > { %v1187_v63 = vpop.xlane.xlu0 %1186 }
 0x514   : > { %v1190_v0 = vpop.xlane.xlu1 %1189 }
 0x515   : > { %2703 = vrcp.f32 %v1190_v0 }
 0x518   : > { %v1193_v1 = vpop.xlane.xlu0 %1192 }
 0x519   : > { %2705 = vrcp.f32 %v1193_v1 }
 0x51a   : > { %2707 = vrcp.f32 %v1187_v63  ;;  %v1196_v2 = vpop.xlane.xlu1 %1195 }
 0x51b   : > { %2709 = vrcp.f32 %v1196_v2 }
 0x51e   : > { %v2576_v3 = vpop.permute.xlu1 %2575 }
 0x51f   : > { %v2578_v4 = vunpack.i.h.bf16 %v2576_v3  ;;  %v2577_v5 = vunpack.i.l.bf16 %v2576_v3  ;;  %v2704_v9 = vpop.eup %2703 }
 0x520   : > { %v1199_v7 = vpop.xlane.xlu0 %1198  ;;  %v1214_v15 = vmul.f32 %v2704_v9, %v2690_v41 }
 0x521   : > { %v919_v8 = vpack.c.bf16 %v2578_v4, %v2577_v5  ;;  %2711 = vrcp.f32 %v1199_v7 }
 0x523   : > { %v2706_v10 = vpop.eup %2705  ;;  %2364 = vmatpush3.bf16.msra.mxu0 %v919_v8 }
 0x524   : > { %v2708_v11 = vpop.eup %2707  ;;  %v2571_v12 = vpop.permute.xlu0 %2570  ;;  %2375 = vmatprep.subr.bf16.mxu0 %v3061_v6  ;;  %v1215_v16 = vmul.f32 %v2706_v10, %v2692_v44 }
 0x525   : > { %v2710_v59 = vpop.eup %2709  ;;  %v2573_v13 = vunpack.i.h.bf16 %v2571_v12  ;;  %v2572_v14 = vunpack.i.l.bf16 %v2571_v12  ;;  %v1213_v19 = vmul.f32 %v2708_v11, %v3658_v37  ;;  %v2631_v37 = vld [vmem:[%s3504_s26] sm:$0xff]  }
 0x526   : > { %v1216_v17 = vmul.f32 %v2710_v59, %v2694_v46  ;;  %v2639_v12 = vld [vmem:[%s3510_s11] ss:$8 sps:$4 sm:$0xff]   ;;  %v2641_v59 = vld [vmem:[%s3510_s11 + $0x4] ss:$8 sps:$4 sm:$0xff]  }
 0x527   : > { %v918_v18 = vpack.c.bf16 %v2573_v13, %v2572_v14  ;;  %v1220_v21 = vpack.c.bf16 %v1214_v15, %v1213_v19  ;;  %v2644_v13 = vld [vmem:[%s3510_s11 + $0x14] ss:$8 sps:$4 sm:$0xff]   ;;  %v2642_v14 = vld [vmem:[%s3510_s11 + $0x10] ss:$8 sps:$4 sm:$0xff]   ;;  %v2647_v15 = vld [vmem:[%s3510_s11 + $0x24] ss:$8 sps:$4 sm:$0xff]  }
 0x528   : > { %v1221_v20 = vpack.c.bf16 %v1216_v17, %v1215_v16  ;;  %v2645_v16 = vld [vmem:[%s3510_s11 + $0x20] ss:$8 sps:$4 sm:$0xff]  }
 0x529   : > { %2358 = vmatpush3.bf16.msra.mxu1 %v918_v18  ;;  %v2727_v18 = vld [vmem:[#allocation2] sm:$0xff] }
 0x52a   : > { %2366 = vmatmul.mubr.msk.bf16.vlgmr.msra.gmra.mrb[8].mxu0 %vm1130_vm7, %v1221_v20  ;;  %2369 = vmatprep.subr.bf16.mxu1 %v3061_v6 }
 0x52b   : > { %2391 = vmatprep.mubr.msk.bf16.mxu0 %vm3063_vm0, %v3061_v6  ;;  %v2712_v27 = vpop.eup %2711  ;;  %2376 = vmatpush3.bf16.msra.mxu0 %v2631_v37  ;;  %v2660_v37 = vld [vmem:[%s3510_s11 + $0x70] ss:$8 sps:$4 sm:$0xff]  }
 0x52c   : > { %2360 = vmatmul.mubr.msk.bf16.vlgmr.msra.gmra.mrb[20].mxu1 %vm1130_vm7, %v1220_v21  ;;  %v1217_v30 = vmul.f32 %v2712_v27, %v3665_v48  ;;  %2377 = vmatprep.subr.bf16.mxu0 %v3061_v6  ;;  %v2650_v27 = vld [vmem:[%s3510_s11 + $0x34] ss:$8 sps:$4 sm:$0xff]  }
 0x52d   : > { %2371 = vmatprep.mubr.msk.bf16.mxu1 %vm3063_vm0, %v3061_v6 }
 0x52f   : > { %2378 = vmatpush3.bf16.msra.mxu0 %v2632_v38 }
 0x530   : > { %2379 = vmatprep.subr.bf16.mxu0 %v3061_v6 }
 0x533   : > { %2380 = vmatpush3.bf16.msra.mxu0 %v2633_v43 }
 0x534   : > { %2381 = vmatprep.subr.bf16.mxu0 %v3061_v6 }
 0x537   : > { %2382 = vmatpush3.bf16.msra.mxu0 %v2634_v49 }
 0x538   : > { %2383 = vmatprep.subr.bf16.mxu0 %v3061_v6 }
 0x53b   : > { %2384 = vmatpush3.bf16.msra.mxu0 %v2635_v50 }
 0x53c   : > { %2385 = vmatprep.subr.bf16.mxu0 %v3061_v6 }
 0x53f   : > { %2386 = vmatpush3.bf16.msra.mxu0 %v2636_v51  ;;  %v2663_v51 = vld [vmem:[%s3512_s24 + $0x40] sm:$0xff]  }
 0x540   : > { %2387 = vmatprep.subr.bf16.mxu0 %v3061_v6 }
 0x543   : > { %2388 = vmatpush3.bf16.msra.mxu0 %v2637_v52  ;;  %v2664_v52 = vld [vmem:[%s3512_s24] sm:$0xff]  }
 0x544   : > { %2389 = vmatprep.subr.bf16.mxu0 %v3061_v6 }
 0x547   : > { %2390 = vmatpush3.bf16.msra.mxu0 %v2638_v53  ;;  %v2665_v53 = vld [vmem:[%s3512_s24 + $0x48] sm:$0xff]  }
 0x548   : > { %2285 = vmatprep.subr.bf16.mxu0 %v2663_v51 }
 0x54f   : > { %v1202_v22 = vpop.xlane.xlu1 %1201 }
 0x550   : > { %2713 = vrcp.f32 %v1202_v22  ;;  %v2728_v22 = vld [vmem:[#allocation2 + $0x8] sm:$0xff] }
 0x553   : > { %v2581_v23 = vpop.permute.xlu1 %2580 }
 0x554   : > { %v2583_v24 = vunpack.i.h.bf16 %v2581_v23  ;;  %v2582_v25 = vunpack.i.l.bf16 %v2581_v23 }
 0x556   : > { %v920_v26 = vpack.c.bf16 %v2583_v24, %v2582_v25 }
 0x558   : > { %2370 = vmatpush3.bf16.msra.mxu1 %v920_v26 }
 0x559   : > { %1659 = vmatprep.subr.bf16.mxu1 %v2641_v59 }
 0x55a   : > { %v2714_v29 = vpop.eup %2713 }
 0x55b   : > { %v1218_v31 = vmul.f32 %v2714_v29, %v2702_v61  ;;  %v2648_v29 = vld [vmem:[%s3510_s11 + $0x30] ss:$8 sps:$4 sm:$0xff]  }
 0x55d   : > { %v1222_v32 = vpack.c.bf16 %v1218_v31, %v1217_v30  ;;  %v2651_v30 = vld [vmem:[%s3510_s11 + $0x40] ss:$8 sps:$4 sm:$0xff]   ;;  %v2653_v31 = vld [vmem:[%s3510_s11 + $0x44] ss:$8 sps:$4 sm:$0xff]  }
 0x55f   : > { %2372 = vmatmul.mubr.msk.bf16.vlgmr.msra.gmra.mrb[24].mxu1 %vm1130_vm7, %v1222_v32  ;;  %v2656_v32 = vld [vmem:[%s3510_s11 + $0x54] ss:$8 sps:$4 sm:$0xff]  }
 0x560   : > { %1691 = vmatprep.mubr.bf16.mxu1 %v3062_v28  ;;  %1660 = vmatpush1.bf16.msra.mxu1 %v2639_v12 }
 0x561   : > { %1661 = vmatprep.subr.bf16.mxu1 %v2644_v13 }
 0x564   : > { %1662 = vmatpush1.bf16.msra.mxu1 %v2642_v14 }
 0x565   : > { %1663 = vmatprep.subr.bf16.mxu1 %v2647_v15 }
 0x568   : > { %1664 = vmatpush1.bf16.msra.mxu1 %v2645_v16 }
 0x569   : > { %1665 = vmatprep.subr.bf16.mxu1 %v2650_v27 }
 0x56c   : > { %1666 = vmatpush1.bf16.msra.mxu1 %v2648_v29 }
 0x56d   : > { %1667 = vmatprep.subr.bf16.mxu1 %v2653_v31 }
 0x570   : > { %1668 = vmatpush1.bf16.msra.mxu1 %v2651_v30 }
 0x571   : > { %1669 = vmatprep.subr.bf16.mxu1 %v2656_v32 }
 0x57e   : > { %v1260_v33 = vpop.f32.mrb[4].mxu0 }
 0x57f   : > { %v2355_v34 = vpop.f32.mrb[5].mxu0 }
 0x580   : > { %v1263_v35 = vpop.f32.mrb[6].mxu0  ;;  %v2659_v34 = vld [vmem:[%s3510_s11 + $0x64] ss:$8 sps:$4 sm:$0xff]  }
 0x581   : > { %v2356_v36 = vpop.f32.mrb[7].mxu0 }
 0x582   : > { %v2662_v36 = vld [vmem:[%s3510_s11 + $0x74] ss:$8 sps:$4 sm:$0xff]  }
 0x5fd   : > { %v1348_v39 = vpop.f32.mrb[8].mxu0 }
 0x5fe   : > { %v2367_v40 = vpop.f32.mrb[9].mxu0 }
 0x5ff   : > { %v1304_v41 = vpop.f32.mrb[20].mxu1  ;;  %v1351_v42 = vpop.f32.mrb[10].mxu0 }
 0x600   : > { %v2589_v44 = vpack.i.bf16 %v1351_v42, %v1348_v39  ;;  %v2361_v28 = vpop.f32.mrb[21].mxu1  ;;  %v2368_v45 = vpop.f32.mrb[11].mxu0 }
 0x601   : > { %v1307_v46 = vpop.f32.mrb[22].mxu1 }
 0x602   : > { %v2584_v47 = vpack.i.bf16 %v1307_v46, %v1304_v41  ;;  %2590 = vrot.lane.b32.xlu1 %v2589_v44, %s3064_s5  ;;  %v2362_v48 = vpop.f32.mrb[23].mxu1  ;;  %v2207_v46 = vld [vmem:[%s551_s10] ss:$0 sm:$0xff] }
 0x604   : > { %2585 = vrot.lane.b32.xlu0 %v2584_v47, %s3066_s25 }
 0x632   : > { %v1392_v54 = vpop.f32.mrb[24].mxu1 }
 0x633   : > { %v2373_v55 = vpop.f32.mrb[25].mxu1 }
 0x634   : > { %v1395_v56 = vpop.f32.mrb[26].mxu1  ;;  %v2667_v55 = vld [vmem:[%s3512_s24 + $0x50] sm:$0xff]  }
 0x635   : > { %v2594_v57 = vpack.i.bf16 %v1395_v56, %v1392_v54  ;;  %v2374_v58 = vpop.f32.mrb[27].mxu1  ;;  %v2666_v54 = vld [vmem:[%s3512_s24 + $0x8] sm:$0xff]   ;;  %v2668_v56 = vld [vmem:[%s3512_s24 + $0x10] sm:$0xff]  }
 0x636   : > { %v2670_v58 = vld [vmem:[%s3512_s24 + $0x18] sm:$0xff]  }
 0x637   : > { %2595 = vrot.lane.b32.xlu0 %v2594_v57, %s3065_s21  ;;  %v2669_v57 = vld [vmem:[%s3512_s24 + $0x58] sm:$0xff]  }
 0x674   : > { %v2591_v63 = vpop.permute.xlu1 %2590 }
 0x675   : > { %v2593_v6 = vunpack.i.h.bf16 %v2591_v63  ;;  %v2592_v2 = vunpack.i.l.bf16 %v2591_v63  ;;  %v2674_v63 = vld [vmem:[%s3512_s24 + $0x28] sm:$0xff]  }
 0x676   : > { %v2586_v60 = vpop.permute.xlu0 %2585 }
 0x677   : > { %v2588_v61 = vunpack.i.h.bf16 %v2586_v60  ;;  %v2587_v62 = vunpack.i.l.bf16 %v2586_v60  ;;  %v2671_v60 = vld [vmem:[%s3512_s24 + $0x60] sm:$0xff]  }
 0x679   : > { %v1424_v0 = vsel %vm921_vm1, %v1263_v35, %v2588_v61  ;;  %v1423_v1 = vsel %vm921_vm1, %v1260_v33, %v2587_v62  ;;  %v2654_v33 = vld [vmem:[%s3510_s11 + $0x50] ss:$8 sps:$4 sm:$0xff]   ;;  %v2657_v35 = vld [vmem:[%s3510_s11 + $0x60] ss:$8 sps:$4 sm:$0xff]  }
 0x67a   : > { %v1426_v7 = vsel %vm1425_vm9, %v1423_v1, %v2592_v2  ;;  %v1427_v8 = vsel %vm1425_vm9, %v1424_v0, %v2593_v6  ;;  %1670 = vmatpush1.bf16.msra.mxu1 %v2654_v33  ;;  %v2672_v61 = vld [vmem:[%s3512_s24 + $0x20] sm:$0xff]   ;;  %v2673_v62 = vld [vmem:[%s3512_s24 + $0x68] sm:$0xff]   ;;  %v2675_v0 = vld [vmem:[%s3512_s24 + $0x70] sm:$0xff]  }
 0x67b   : > { %1671 = vmatprep.subr.bf16.mxu1 %v2659_v34  ;;  %v2676_v1 = vld [vmem:[%s3512_s24 + $0x30] sm:$0xff]   ;;  %v2677_v6 = vld [vmem:[%s3512_s24 + $0x78] sm:$0xff]  }
 0x67c   : > { %v2678_v2 = vld [vmem:[%s3512_s24 + $0x38] sm:$0xff]   ;;  %s3930_s24 = sld [smem:[#allocation24_spill]] }
 0x67e   : > { %1672 = vmatpush1.bf16.msra.mxu1 %v2657_v35 }
 0x67f   : > { %1673 = vmatprep.subr.bf16.mxu1 %v2662_v36 }
 0x682   : > { %1674 = vmatpush1.bf16.msra.mxu1 %v2660_v37  ;;  %p2240_p10 = scmp.ne.s32.totalorder %s3930_s24, 1 }
 0x6a9   : > { %v2596_v3 = vpop.permute.xlu0 %2595 }
 0x6aa   : > { %v2598_v4 = vunpack.i.h.bf16 %v2596_v3  ;;  %v2597_v5 = vunpack.i.l.bf16 %v2596_v3 }
 0x6ac   : > { %v1430_v9 = vsel %vm1428_vm10, %v1427_v8, %v2598_v4  ;;  %v1429_v10 = vsel %vm1428_vm10, %v1426_v7, %v2597_v5 }
 0x6ad   : > { %v1431_v11 = vpack.c.bf16 %v1430_v9, %v1429_v10 }
 0x6af   : > { %2392 = vmatmul.mubr.bf16.vlgmr.msra.gmra.mrb[12].mxu0 %v1431_v11 }
 0x6b0   : > { %2286 = vmatpush3.bf16.msra.mxu0 %v2664_v52 }
 0x6b1   : > { %2287 = vmatprep.subr.bf16.mxu0 %v2665_v53 }
 0x6b4   : > { %2288 = vmatpush3.bf16.msra.mxu0 %v2666_v54 }
 0x6b5   : > { %2289 = vmatprep.subr.bf16.mxu0 %v2667_v55 }
 0x6b8   : > { %2290 = vmatpush3.bf16.msra.mxu0 %v2668_v56 }
 0x6b9   : > { %2291 = vmatprep.subr.bf16.mxu0 %v2669_v57 }
 0x6bc   : > { %2292 = vmatpush3.bf16.msra.mxu0 %v2670_v58 }
 0x6bd   : > { %2293 = vmatprep.subr.bf16.mxu0 %v2671_v60 }
 0x6c0   : > { %2294 = vmatpush3.bf16.msra.mxu0 %v2672_v61 }
 0x6c1   : > { %2295 = vmatprep.subr.bf16.mxu0 %v2673_v62 }
 0x6c4   : > { %2296 = vmatpush3.bf16.msra.mxu0 %v2674_v63 }
 0x6c5   : > { %2297 = vmatprep.subr.bf16.mxu0 %v2675_v0 }
 0x6c8   : > { %2298 = vmatpush3.bf16.msra.mxu0 %v2676_v1 }
 0x6c9   : > { %2299 = vmatprep.subr.bf16.mxu0 %v2677_v6 }
 0x6cc   : > { %2300 = vmatpush3.bf16.msra.mxu0 %v2678_v2 }
 0x782   : > { %v1530_v17 = vpop.f32.mrb[12].mxu0 }
 0x783   : > { %v3718_v19 = vadd.f32 %v2727_v18, %v1530_v17  ;;  %v2393_v20 = vpop.f32.mrb[13].mxu0 }
 0x784   : > { %v1533_v21 = vpop.f32.mrb[14].mxu0 }
 0x785   : > { %v3720_v23 = vadd.f32 %v2728_v22, %v1533_v21  ;;  %v2394_v24 = vpop.f32.mrb[15].mxu0  ;;  %v1540_v25 = vmul.f32 %v3718_v19, %v3718_v19 }
 0x787   : > { %1542 = vadd.xlane.f32.xlu1 %v1540_v25  ;;  %v1541_v26 = vmul.f32 %v3720_v23, %v3720_v23 }
 0x789   : > { %1544 = vadd.xlane.f32.xlu0 %v1541_v26 }
 0x814   : > { %v1543_v38 = vpop.xlane.xlu1 %1542 }
 0x815   : > { %v1546_v39 = vmul.f32 0.0078125, %v1543_v38 }
 0x816   : > { %v1545_v40 = vpop.xlane.xlu0 %1544 }
 0x817   : > { %v1548_v41 = vadd.f32 1e-06, %v1546_v39  ;;  %v1547_v42 = vmul.f32 0.0078125, %v1545_v40 }
 0x819   : > { %2715 = vrsqrt.f32 %v1548_v41  ;;  %v1549_v43 = vadd.f32 1e-06, %v1547_v42 }
 0x81b   : > { %2717 = vrsqrt.f32 %v1549_v43 }
 0x823   : > { %v2716_v44 = vpop.eup %2715 }
 0x824   : > { %v1552_v28 = vmul.f32 %v2716_v44, %v3718_v19 }
 0x825   : > { %v2718_v45 = vpop.eup %2717 }
 0x826   : > { %v1553_v47 = vmul.f32 %v2718_v45, %v3720_v23  ;;  %v1560_v48 = vmul.f32 %v2207_v46, %v1552_v28 }
 0x828   : > { %v1561_v49 = vmul.f32 %v2207_v46, %v1553_v47 }
 0x82a   : > { %v1562_v50 = vpack.c.bf16 %v1561_v49, %v1560_v48 }
 0x82c   : > { %1692 = vmatmul.mubr.bf16.vlgmr.msra.gmra.mrb[28].mxu1 %v1562_v50 }
 0x8ff   : > { %v1693_v3 = vpop.f32.mrb[28].mxu1 }
 0x900   : > { %v1706_v4 = vmul.f32 0.044715, %v1693_v3  ;;  %v1695_v5 = vpop.f32.mrb[29].mxu1  ;;  %v1702_v36 = vmul.f32 0.5, %v1693_v3 }
 0x901   : > { %v1707_v7 = vmul.f32 0.044715, %v1695_v5  ;;  %v1697_v8 = vpop.f32.mrb[30].mxu1  ;;  %v1703_v40 = vmul.f32 0.5, %v1695_v5 }
 0x902   : > { %v1710_v9 = vmul.f32 %v1706_v4, %v1693_v3  ;;  %v1708_v10 = vmul.f32 0.044715, %v1697_v8  ;;  %v1699_v11 = vpop.f32.mrb[31].mxu1  ;;  %v1704_v37 = vmul.f32 0.5, %v1697_v8 }
 0x903   : > { %v1711_v12 = vmul.f32 %v1707_v7, %v1695_v5  ;;  %v1709_v59 = vmul.f32 0.044715, %v1699_v11  ;;  %v1705_v39 = vmul.f32 0.5, %v1699_v11 }
 0x904   : > { %v1714_v13 = vmul.f32 %v1710_v9, %v1693_v3  ;;  %v1712_v14 = vmul.f32 %v1708_v10, %v1697_v8 }
 0x905   : > { %v1715_v15 = vmul.f32 %v1711_v12, %v1695_v5  ;;  %v1713_v16 = vmul.f32 %v1709_v59, %v1699_v11 }
 0x906   : > { %v1718_v17 = vadd.f32 %v1714_v13, %v1693_v3  ;;  %v1716_v18 = vmul.f32 %v1712_v14, %v1697_v8 }
 0x907   : > { %v1719_v20 = vadd.f32 %v1715_v15, %v1695_v5  ;;  %v1717_v21 = vmul.f32 %v1713_v16, %v1699_v11 }
 0x908   : > { %v1722_v22 = vmul.f32 0.7978846, %v1718_v17  ;;  %v1720_v24 = vadd.f32 %v1716_v18, %v1697_v8 }
 0x909   : > { %v1723_v25 = vmul.f32 0.7978846, %v1719_v20  ;;  %v1721_v26 = vadd.f32 %v1717_v21, %v1699_v11 }
 0x90a   : > { %2719 = vtanh.f32 %v1722_v22  ;;  %v1724_v27 = vmul.f32 0.7978846, %v1720_v24 }
 0x90b   : > { %2721 = vtanh.f32 %v1723_v25  ;;  %v1725_v29 = vmul.f32 0.7978846, %v1721_v26 }
 0x90c   : > { %2723 = vtanh.f32 %v1724_v27 }
 0x90d   : > { %2725 = vtanh.f32 %v1725_v29 }
 0x914   : > { %v2720_v30 = vpop.eup %2719 }
 0x915   : > { %v2722_v31 = vpop.eup %2721  ;;  %v1730_v32 = vadd.f32 1.0, %v2720_v30 }
 0x916   : > { %v2724_v33 = vpop.eup %2723  ;;  %v1731_v34 = vadd.f32 1.0, %v2722_v31 }
 0x917   : > { %v2726_v35 = vpop.eup %2725  ;;  %v1732_v38 = vadd.f32 1.0, %v2724_v33  ;;  %v1734_v42 = vmul.f32 %v1730_v32, %v1702_v36 }
 0x918   : > { %v1733_v41 = vadd.f32 1.0, %v2726_v35  ;;  %v1735_v44 = vmul.f32 %v1731_v34, %v1703_v40 }
 0x919   : > { %v1736_v43 = vmul.f32 %v1732_v38, %v1704_v37 }
 0x91a   : > { %v1737_v28 = vmul.f32 %v1733_v41, %v1705_v39 }
 0x91b   : > { %v1738_v45 = vpack.c.bf16 %v1736_v43, %v1734_v42 }
 0x91c   : > { %v1739_v46 = vpack.c.bf16 %v1737_v28, %v1735_v44 }
 0x91e   : > { %1900 = vmatprep.mubr.bf16.mxu0 %v1739_v46 }
 0x91f   : > { %1901 = vmatmul.mubr.bf16.vlgmr.msra.gmra.mrb[16].mxu0 %v1738_v45 }
 0x9f2   : > { %v2301_v47 = vpop.f32.mrb[16].mxu0 }
 0x9f3   : > { %v2302_v48 = vpop.f32.mrb[17].mxu0 }
 0x9f4   : > { %v2303_v49 = vadd.f32 %v2302_v48, %v2301_v47  ;;  %v2304_v50 = vpop.f32.mrb[18].mxu0  ;;  %1916 = sbr.rel (%p2240_p10) target bundleno = 2555 (0x9fb), region = 84 }
 0x9f5   : > { %v2305_v51 = vpop.f32.mrb[19].mxu0 }
 0x9f6   : > { %v1909_v52 = vadd.f32 %v2303_v49, %v3718_v19  ;;  %v2306_v53 = vadd.f32 %v2305_v51, %v2304_v50 }
 0x9f8   : > { %1911 = vst [vmem:[#allocation2] sm:$0xff] %v1909_v52  ;;  %v1910_v54 = vadd.f32 %v2306_v53, %v3720_v23  ;;  %1917 = vst [vmem:[%s3530_s20] sm:$0xff] (!%p2240_p10), %v1909_v52 }
 0x9fa   : > { %1912 = vst [vmem:[#allocation2 + $0x8] sm:$0xff] %v1910_v54  ;;  %1918 = vst [vmem:[%s3530_s20 + $0x8] sm:$0xff] (!%p2240_p10), %v1910_v54 }
 0x9fb PF: > { %s3931_s28 = sld [smem:[#allocation25_spill]]  ;;  %s3932_s19 = sld [smem:[#allocation27_spill]] }
 0x9fc   : > { %s3933_s16 = sld [smem:[#allocation37_spill]]  ;;  %s1933_s18 = sshll.u32 %s3530_s20, 4  ;;  %s3771_s18 = int_to_ptr.vmem [resolvable:$true] %s1933_s18 }
 0x9fd   : > { %s1920_s10 = scalar_lea.sflag [#allocation5], %s3483_s8  ;;  %s2909_s1 = scalar_lea.vmem %s3771_s18, 256 }
 0x9fe   : > { %p2910_p12 = scmp.ne.s32.totalorder %s3771_s18, %s2909_s1  ;;  %s3067_s23 = smov [#allocation14]  }
 0x9ff   : > { %s2913_s4 = sshll.u32 %s3067_s23, 4  ;;  %s2914_s4 = int_to_ptr.vmem [resolvable:$false] %s2913_s4 }
 0xa00   : > { %s2915_s5 = scalar_lea.vmem %s2914_s4, 512  ;;  %p2916_p5 = scmp.lt.s32.totalorder %s3771_s18, %s2914_s4 }
 0xa01   : > { %s2250_s27 = sshll.u32 %s3931_s28, 8  ;;  %p3934_p13 = scmp.ne.s32.totalorder %s3932_s19, 0 }
 0xa02   : > { %s3768_s17 = scalar_lea.hbm %s3933_s16, %s2250_s27  ;;  %p2917_p9 = scmp.lt.s32.totalorder %s2915_s5, %s2909_s1 }
 0xa03   : > { %p2911_p7 = pnand %p2910_p12, %p3934_p13 }
 0xa04   : > { %p2918_p3 = por %p2917_p9, %p2916_p5 }
 0xa05   : > { %p2912_p6 = pneg %p2911_p7 }
 0xa07   : > { %p2919_p8 = pnand %p2918_p3, %p2912_p6 }
 0xa09   : > { %2922 = shalt.err (!%p2919_p8)
}
 0xa0a   : > { %s2923_s20 = scalar_lea.hbm %s3768_s17, 256  ;;  %s2927_s30 = scalar_lea.hbm %s3933_s16, 512 }
 0xa0b   : > { %p2924_p4 = scmp.ne.s32.totalorder %s3768_s17, %s2923_s20  ;;  %p2928_p0 = scmp.lt.u32.totalorder %s3768_s17, %s3933_s16 }
 0xa0c   : > { %p2929_p11 = scmp.lt.u32.totalorder %s2927_s30, %s2923_s20  ;;  %p2931_p12 = scmp.lt.u32.totalorder %s2923_s20, %s3768_s17 }
 0xa0d   : > { %p2925_p1 = pnand %p2924_p4, %p3934_p13 }
 0xa0e   : > { %p2930_p10 = por %p2929_p11, %p2928_p0 }
 0xa0f   : > { %p2926_p2 = pneg %p2925_p1 }
 0xa10   : > { %p2932_p7 = por %p2931_p12, %p2930_p10 }
 0xa12   : > { %p2933_p6 = pnand %p2932_p7, %p2926_p2 }
 0xa14   : > { %2936 = shalt.err (!%p2933_p6)
}
 0xa15   : > { %s3068_s24 = smov 128   ;;  %s3069_s28 = smov 8  }
 0xa16   : > { %2410 = dma.vmem_to_hbm [thread:$0]  (%p3934_p13), %s3771_s18, 256, %s3768_s17, %s1920_s10, %s3068_s24, %s3068_s24, %s3069_s28  }
 0xa17 PF: > { %s3935_s27 = sld [smem:[#allocation22_spill]]  ;;  %s3936_s22 = sld [smem:[#allocation28_spill]] }
 0xa18   : > { %p2436_p5 = scmp.ge.s32.totalorder %s3047_s15, 2 }
 0xa1d   : > { %s1948_s3 = sand.u32 1, %s3935_s27   ;;  %p3937_p9 = scmp.ne.s32.totalorder %s3936_s22, 0 }
 0xa1e   : > { %s1949_s1 = scalar_lea.sflag [#allocation5], %s1948_s3 }
 0xa1f   : > { %p2432_p3 = pnand %p2436_p5, %p3937_p9 }
 0xa21   : > { %3002 = dma.done.wait (!%p2432_p3), %s1949_s1, 256  }
 0xa22   : > { %3004 = vsyncadd (!%p2432_p3), %s1949_s1, 4294967040  ;;  %s33_s15 = sadd.s32 1, %s3047_s15   ;;  %s3938_s27 = sld [smem:[#allocation21_spill]] }
 0xa23   : > { %p30_p8 = scmp.ge.s32.totalorder %s33_s15, 6   ;;  %s3939_s8 = sld [smem:[#allocation23_spill]] }
 0xa24   : > { %s3940_s10 = sld [smem:[#allocation32_spill]]  ;;  %s3941_s19 = sld [smem:[#allocation29_spill]] }
 0xa25   : > { %s3942_s17 = sld [smem:[#allocation31_spill]]  ;;  %s3943_s28 = smov %s3015_s29 }
 0xa26   : > { %s3944_s29 = smov %s3293_s12  ;;  %s3945_s30 = smov %s3023_s9 }
 0xa27   : > { %s3947_s11 = smov %s3039_s13  ;;  %s3948_s12 = smov %s3043_s14 }
 0xa28   :  { %32 = sbr.rel (!%p30_p8) target bundleno = 21 (0x15), region = 172 }
 0xa29   : > { %s3946_s9 = smov %s3939_s8 }
 0xa2a   : > { %s3949_s13 = smov %s3941_s19 }
 0xa2b   : > { %s3950_s14 = smov %s3942_s17 }
 0xa2f   :  { %1954 = vsyncpa [#allocation4], 1 }
 0xa30   :  { %1956 = vsyncpa [#allocation4 + $0x1], 1 }
 0xa31   :  { %1957 = vsyncpa [#allocation7], 1 }
 0xa32   :  { %1959 = vsyncpa [#allocation7 + $0x1], 1 }
 0xa33   :  { %1960 = vsyncpa [#allocation10], 1 }
 0xa34   :  { %1962 = vsyncpa [#allocation10 + $0x1], 1 }
 0xa35   :  { %1963 = vsyncpa [#allocation13], 1 }
 0xa36   :  { %1965 = vsyncpa [#allocation13 + $0x1], 1 }
 0xa37   :  { %1966 = vsyncpa [#allocation5], 1 }
 0xa38   :  { %1968 = vsyncpa [#allocation5 + $0x1], 1 }

</bundles_post_ra>
